<compile_context>
chip_gen: v7x
topology: tpu7x:2x2x1
jax: 0.10.0
libtpu: 0.0.40
codegen_flags: <defaults>
</compile_context>

<pallas_src>
import functools

import jax
import jax.numpy as jnp
from jax import lax
from jax.experimental import pallas as pl
from jax.experimental.pallas import tpu as pltpu


_MAX_BLOCK_ROWS = 128  # cap on the in-kernel re-tile unroll length


def _vmem_capacity_bytes():
    """Physical VMEM per TensorCore; conservative 64 MiB (v7x) if unqueryable."""
    try:
        info = pltpu.get_tpu_info()
        cap = int(getattr(info, "vmem_capacity_bytes", 0))
        if cap > 0:
            return cap
    except Exception:
        pass
    return 64 * 1024 * 1024


def _vmem_estimate_bytes(c_in, c4, tr, width):
    """Per-grid-step VMEM footprint estimate (f32), incl. double buffering."""
    trw = tr * width
    elems = (2 * c_in * trw                 # x block, double buffered
             + 2 * c4 * trw                 # out block, double buffered
             + 6 * c4 * trw                 # y, r, z0/z1 intermediates
             + c4 * tr * max(width, 128)    # re-tile scratch (lane padded)
             + 2 * (c4 * c_in + c4 + 4 * width * width))  # weights, bias, S
    return 4 * elems


def _pick_block_rows(H, W, c_in, c4, budget_bytes, batch):
    """Largest legal row-block Tr whose per-step footprint fits the VMEM budget.

    Tr must either cover the full image (Tr == H) or be sublane/lane friendly
    (Tr % 8 == 0 and Tr*W % 128 == 0) so every BlockSpec tile is well formed.
    """
    cands = [tr for tr in range(1, H + 1)
             if H % tr == 0 and (tr == H or (tr % 8 == 0 and (tr * W) % 128 == 0))]
    fitting = [tr for tr in cands
               if tr <= _MAX_BLOCK_ROWS
               and _vmem_estimate_bytes(c_in, c4, tr, W) <= budget_bytes]
    if not fitting:
        # TODO(synk): add a width-tiling path for huge rows that never fit VMEM.
        return min(cands)
    if batch == 1:
        halved = [tr for tr in fitting if H // tr >= 2]
        if halved:
            # >= 2 grid steps so both v7x TensorCores get work (grid is parallel).
            return max(halved)
    return max(fitting)


def _upsample_ps2_kernel(x_ref, w_ref, b_ref, s_ref, o_ref, y_scr,
                         *, c_out, block_rows, width):
    """One (batch, row-block) step: 1x1 conv + PixelShuffle(2).

    x_ref : (1, Cin, Tr*W)        input rows, spatial flattened (lane dense)
    w_ref : (4*Cout, Cin)         conv weight, rows ordered s*Cout + c  (s = 2i+j)
    b_ref : (4*Cout, 1)           conv bias, same row order
    s_ref : (W, 4*W)              fused 0/1 scatter matrix [S0 | S1], resident
    o_ref : (1, Cout, Tr, 4*W)    output slab; flattening == NCHW (2H, 2W) layout
    y_scr : VMEM (4*Cout, Tr, W)  re-tile scratch (lane (h,w) -> sublane h, lane w)
    """
    Tr, W, Co = block_rows, width, c_out
    W2 = 2 * W

    x = x_ref[0]                                            # (Cin, Tr*W)

    # ---- 1x1 conv: one lane-dense MXU matmul + bias (f32, matches PyTorch) --
    y = jnp.dot(w_ref[...], x,
                preferred_element_type=jnp.float32,
                precision=lax.Precision.HIGHEST) + b_ref[...]
    # y: (4*Cout, Tr*W), row = s*Cout + c, lane = h*W + w

    # ---- re-tile so the lane axis is w only (needed for the j-interleave) ---
    # Kept as an explicit scratch roundtrip (guaranteed lowering); see TODO(synk)
    # at the top of the file.
    for h in range(Tr):                                     # static unrolled loop
        y_scr[:, h, :] = y[:, h * W:(h + 1) * W]
    y4 = y_scr[...].reshape(4 * Co * Tr, W)                 # row = (s, c, h), lane = w

    # ---- PixelShuffle width interleave: ONE fused scatter matmul ------------
    # s_ref = [S0 | S1] with S0[w, 2w] = 1 and S1[w, 2w+1] = 1 (exact selection).
    r = jnp.dot(y4, s_ref[...],
                preferred_element_type=jnp.float32,
                precision=lax.Precision.HIGHEST)            # (4*Co*Tr, 4W)

    ch = Co * Tr
    # r rows: block s in [0,4) with s = 2*i + j;  r[:, :2W] = even lanes (j=0),
    # r[:, 2W:] = odd lanes (j=1).
    z0 = r[0 * ch:1 * ch, :W2] + r[1 * ch:2 * ch, W2:]      # i = 0 : (Co*Tr, 2W)
    z1 = r[2 * ch:3 * ch, :W2] + r[3 * ch:4 * ch, W2:]      # i = 1 : (Co*Tr, 2W)

    # ---- height interleave falls out of the (H, 4W) output layout -----------
    # o[b, c, h, i*2W + (2w+j)] == NCHW[b, c, 2h+i, 2w+j]
    o_ref[0, :, :, 0:W2] = z0.reshape(Co, Tr, W2).astype(o_ref.dtype)
    o_ref[0, :, :, W2:2 * W2] = z1.reshape(Co, Tr, W2).astype(o_ref.dtype)


def upsample_pixel_shuffle(x, conv_weight, conv_bias):
    """x: (B, Cin, H, W) NCHW; conv_weight: (4*Cout, Cin, 1, 1); conv_bias: (4*Cout,).

    Returns PixelShuffle(2)(Conv2d_1x1(x)) with shape (B, Cout, 2H, 2W).
    """
    B, Cin, H, W = x.shape
    c4 = conv_weight.shape[0]
    assert c4 % 4 == 0, "conv out_channels must be a multiple of 4 (PixelShuffle(2))"
    Co = c4 // 4

    # Reorder weight rows: new row s*Cout + c  <-  torch conv channel c*4 + s.
    w2 = conv_weight.reshape(c4, Cin)
    w_r = w2.reshape(Co, 4, Cin).transpose(1, 0, 2).reshape(c4, Cin).astype(x.dtype)
    b_r = conv_bias.reshape(Co, 4).T.reshape(c4, 1).astype(x.dtype)

    # Fused width-interleave scatter matrix S = [S0 | S1], built once, DMA'd once.
    wi = jnp.arange(W)
    scat = jnp.zeros((W, 4 * W), jnp.float32)
    scat = scat.at[wi, 2 * wi].set(1.0)                     # S0[w, 2w]   = 1
    scat = scat.at[wi, 2 * W + 2 * wi + 1].set(1.0)         # S1[w, 2w+1] = 1

    # Generation-aware tiling / VMEM budget (64 MiB on v7x, 128 MiB on v5e/v6e).
    vmem_cap = _vmem_capacity_bytes()
    budget_bytes = int(0.55 * vmem_cap)
    Tr = _pick_block_rows(H, W, Cin, c4, budget_bytes, B)
    n_tiles = H // Tr
    trw = Tr * W

    est = _vmem_estimate_bytes(Cin, c4, Tr, W)
    vmem_limit = int(min(0.85 * vmem_cap, max(32 * (1 << 20), 1.5 * est)))
    vmem_limit = max(vmem_limit, est)

    x2 = x.reshape(B, Cin, H * W)                           # free metadata reshape

    kernel = functools.partial(
        _upsample_ps2_kernel, c_out=Co, block_rows=Tr, width=W)

    out4 = pl.pallas_call(
        kernel,
        out_shape=jax.ShapeDtypeStruct((B, Co, H, 4 * W), x.dtype),
        grid_spec=pltpu.PrefetchScalarGridSpec(
            num_scalar_prefetch=0,
            grid=(B, n_tiles),
            in_specs=[
                pl.BlockSpec((1, Cin, trw), lambda b, t: (b, 0, t)),
                pl.BlockSpec((c4, Cin), lambda b, t: (0, 0)),     # resident weight
                pl.BlockSpec((c4, 1), lambda b, t: (0, 0)),       # resident bias
                pl.BlockSpec((W, 4 * W), lambda b, t: (0, 0)),    # resident scatter
            ],
            out_specs=pl.BlockSpec((1, Co, Tr, 4 * W), lambda b, t: (b, 0, t, 0)),
            scratch_shapes=[pltpu.VMEM((c4, Tr, W), jnp.float32)],
        ),
        compiler_params=pltpu.CompilerParams(
            dimension_semantics=("parallel", "parallel"),
            vmem_limit_bytes=vmem_limit,
        ),
    )(x2, w_r, b_r, scat)

    # (B, Cout, H, 4W) row-major == (B, Cout, 2H, 2W) row-major -> free reshape.
    return out4.reshape(B, Co, 2 * H, 2 * W)


def _reference(x, conv_weight, conv_bias):
    B, Cin, H, W = x.shape
    c4 = conv_weight.shape[0]
    Co = c4 // 4
    w2 = conv_weight.reshape(c4, Cin)
    conv = jnp.einsum('oc,bchw->bohw', w2, x,
                      precision=lax.Precision.HIGHEST) + conv_bias[None, :, None, None]
    out = conv.reshape(B, Co, 2, 2, H, W)
    out = out.transpose(0, 1, 4, 2, 5, 3)                   # (B, Co, H, 2, W, 2)
    return out.reshape(B, Co, 2 * H, 2 * W)


if __name__ == "__main__":
    B, IN_CH, OUT_CH, H, W = 2, 8, 4, 16, 16

    key = jax.random.PRNGKey(0)
    kx, kw, kb = jax.random.split(key, 3)
    x = jax.random.normal(kx, (B, IN_CH, H, W), jnp.float32)
    conv_weight = jax.random.normal(kw, (4 * OUT_CH, IN_CH, 1, 1), jnp.float32) * 0.1
    conv_bias = jax.random.normal(kb, (4 * OUT_CH,), jnp.float32) * 0.1

    out = upsample_pixel_shuffle(x, conv_weight, conv_bias)
    out = jax.block_until_ready(out)

    ref = _reference(x, conv_weight, conv_bias)

    assert out.shape == (B, OUT_CH, 2 * H, 2 * W), out.shape
    assert jnp.all(jnp.isfinite(out))
    max_err = float(jnp.max(jnp.abs(out - ref)))
    assert jnp.allclose(out, ref, atol=2e-3, rtol=2e-3), max_err

    print("KERNEL_OK")
</pallas_src>

<mosaic_0001>
module attributes {stable_mosaic.version = 11 : i64} {
  func.func @_upsample_ps2_kernel(%arg0: i32, %arg1: i32, %arg2: memref<1x8x256xf32, #tpu.memory_space<vmem>>, %arg3: memref<16x8xf32, #tpu.memory_space<vmem>>, %arg4: memref<16x1xf32, #tpu.memory_space<vmem>>, %arg5: memref<16x64xf32, #tpu.memory_space<vmem>>, %arg6: memref<1x4x16x64xf32, #tpu.memory_space<vmem>>, %arg7: memref<16x16x16xf32, #tpu.memory_space<vmem>>) attributes {dimension_semantics = [#tpu.dimension_semantics<parallel>, #tpu.dimension_semantics<parallel>], iteration_bounds = array<i64: 2, 1>, scalar_prefetch = 0 : i64, scratch_operands = 1 : i64, tpu.core_type = #tpu.core_type<tc>, window_params = [{transform_indices = @transform_0, window_bounds = array<i64: 1, 8, 256>}, {pipeline_mode = #tpu.pipeline_mode<synchronous>, transform_indices = @transform_1, window_bounds = array<i64: 16, 8>}, {pipeline_mode = #tpu.pipeline_mode<synchronous>, transform_indices = @transform_2, window_bounds = array<i64: 16, 1>}, {pipeline_mode = #tpu.pipeline_mode<synchronous>, transform_indices = @transform_3, window_bounds = array<i64: 16, 64>}, {transform_indices = @transform_4, window_bounds = array<i64: 1, 4, 16, 64>}]} {
    %c0 = arith.constant 0 : index
    %c0_0 = arith.constant 0 : index
    %c0_1 = arith.constant 0 : index
    %0 = vector.load %arg2[%c0, %c0_0, %c0_1] : memref<1x8x256xf32, #tpu.memory_space<vmem>>, vector<1x8x256xf32>
    %1 = vector.shape_cast %0 : vector<1x8x256xf32> to vector<8x256xf32>
    %c0_2 = arith.constant 0 : index
    %c0_3 = arith.constant 0 : index
    %2 = vector.load %arg3[%c0_2, %c0_3] : memref<16x8xf32, #tpu.memory_space<vmem>>, vector<16x8xf32>
    %cst = arith.constant dense<0.000000e+00> : vector<16x256xf32>
    %3 = tpu.matmul %2, %1, %cst {dimension_numbers = #tpu.dot_dimension_numbers<[1], [0], [0], [1], [0, 0, 1, 1], [], []>, precision = #tpu.contract_precision<fp32>} : vector<16x8xf32>, vector<8x256xf32>, vector<16x256xf32> -> vector<16x256xf32>
    %c0_4 = arith.constant 0 : index
    %c0_5 = arith.constant 0 : index
    %4 = vector.load %arg4[%c0_4, %c0_5] : memref<16x1xf32, #tpu.memory_space<vmem>>, vector<16x1xf32>
    %5 = vector.broadcast %4 : vector<16x1xf32> to vector<16x256xf32>
    %6 = arith.addf %3, %5 : vector<16x256xf32>
    %7 = vector.extract_strided_slice %6 {offsets = [0, 0], sizes = [16, 16], strides = [1, 1]} : vector<16x256xf32> to vector<16x16xf32>
    %c0_6 = arith.constant 0 : index
    %c0_7 = arith.constant 0 : index
    %c0_8 = arith.constant 0 : index
    %8 = vector.load %arg7[%c0_6, %c0_7, %c0_8] : memref<16x16x16xf32, #tpu.memory_space<vmem>>, vector<16x1x16xf32>
    %9 = vector.shape_cast %8 : vector<16x1x16xf32> to vector<16x16xf32>
    %10 = vector.shape_cast %7 : vector<16x16xf32> to vector<16x1x16xf32>
    tpu.vector_store %arg7[%c0_6, %c0_7, %c0_8], %10 {strides = array<i32>} : memref<16x16x16xf32, #tpu.memory_space<vmem>>, vector<16x1x16xf32>,
    %11 = vector.extract_strided_slice %6 {offsets = [0, 16], sizes = [16, 16], strides = [1, 1]} : vector<16x256xf32> to vector<16x16xf32>
    %c0_9 = arith.constant 0 : index
    %c1 = arith.constant 1 : index
    %c0_10 = arith.constant 0 : index
    %12 = vector.load %arg7[%c0_9, %c1, %c0_10] : memref<16x16x16xf32, #tpu.memory_space<vmem>>, vector<16x1x16xf32>
    %13 = vector.shape_cast %12 : vector<16x1x16xf32> to vector<16x16xf32>
    %14 = vector.shape_cast %11 : vector<16x16xf32> to vector<16x1x16xf32>
    tpu.vector_store %arg7[%c0_9, %c1, %c0_10], %14 {strides = array<i32>} : memref<16x16x16xf32, #tpu.memory_space<vmem>>, vector<16x1x16xf32>,
    %15 = vector.extract_strided_slice %6 {offsets = [0, 32], sizes = [16, 16], strides = [1, 1]} : vector<16x256xf32> to vector<16x16xf32>
    %c0_11 = arith.constant 0 : index
    %c2 = arith.constant 2 : index
    %c0_12 = arith.constant 0 : index
    %16 = vector.load %arg7[%c0_11, %c2, %c0_12] : memref<16x16x16xf32, #tpu.memory_space<vmem>>, vector<16x1x16xf32>
    %17 = vector.shape_cast %16 : vector<16x1x16xf32> to vector<16x16xf32>
    %18 = vector.shape_cast %15 : vector<16x16xf32> to vector<16x1x16xf32>
    tpu.vector_store %arg7[%c0_11, %c2, %c0_12], %18 {strides = array<i32>} : memref<16x16x16xf32, #tpu.memory_space<vmem>>, vector<16x1x16xf32>,
    %19 = vector.extract_strided_slice %6 {offsets = [0, 48], sizes = [16, 16], strides = [1, 1]} : vector<16x256xf32> to vector<16x16xf32>
    %c0_13 = arith.constant 0 : index
    %c3 = arith.constant 3 : index
    %c0_14 = arith.constant 0 : index
    %20 = vector.load %arg7[%c0_13, %c3, %c0_14] : memref<16x16x16xf32, #tpu.memory_space<vmem>>, vector<16x1x16xf32>
    %21 = vector.shape_cast %20 : vector<16x1x16xf32> to vector<16x16xf32>
    %22 = vector.shape_cast %19 : vector<16x16xf32> to vector<16x1x16xf32>
    tpu.vector_store %arg7[%c0_13, %c3, %c0_14], %22 {strides = array<i32>} : memref<16x16x16xf32, #tpu.memory_space<vmem>>, vector<16x1x16xf32>,
    %23 = vector.extract_strided_slice %6 {offsets = [0, 64], sizes = [16, 16], strides = [1, 1]} : vector<16x256xf32> to vector<16x16xf32>
    %c0_15 = arith.constant 0 : index
    %c4 = arith.constant 4 : index
    %c0_16 = arith.constant 0 : index
    %24 = vector.load %arg7[%c0_15, %c4, %c0_16] : memref<16x16x16xf32, #tpu.memory_space<vmem>>, vector<16x1x16xf32>
    %25 = vector.shape_cast %24 : vector<16x1x16xf32> to vector<16x16xf32>
    %26 = vector.shape_cast %23 : vector<16x16xf32> to vector<16x1x16xf32>
    tpu.vector_store %arg7[%c0_15, %c4, %c0_16], %26 {strides = array<i32>} : memref<16x16x16xf32, #tpu.memory_space<vmem>>, vector<16x1x16xf32>,
    %27 = vector.extract_strided_slice %6 {offsets = [0, 80], sizes = [16, 16], strides = [1, 1]} : vector<16x256xf32> to vector<16x16xf32>
    %c0_17 = arith.constant 0 : index
    %c5 = arith.constant 5 : index
    %c0_18 = arith.constant 0 : index
    %28 = vector.load %arg7[%c0_17, %c5, %c0_18] : memref<16x16x16xf32, #tpu.memory_space<vmem>>, vector<16x1x16xf32>
    %29 = vector.shape_cast %28 : vector<16x1x16xf32> to vector<16x16xf32>
    %30 = vector.shape_cast %27 : vector<16x16xf32> to vector<16x1x16xf32>
    tpu.vector_store %arg7[%c0_17, %c5, %c0_18], %30 {strides = array<i32>} : memref<16x16x16xf32, #tpu.memory_space<vmem>>, vector<16x1x16xf32>,
    %31 = vector.extract_strided_slice %6 {offsets = [0, 96], sizes = [16, 16], strides = [1, 1]} : vector<16x256xf32> to vector<16x16xf32>
    %c0_19 = arith.constant 0 : index
    %c6 = arith.constant 6 : index
    %c0_20 = arith.constant 0 : index
    %32 = vector.load %arg7[%c0_19, %c6, %c0_20] : memref<16x16x16xf32, #tpu.memory_space<vmem>>, vector<16x1x16xf32>
    %33 = vector.shape_cast %32 : vector<16x1x16xf32> to vector<16x16xf32>
    %34 = vector.shape_cast %31 : vector<16x16xf32> to vector<16x1x16xf32>
    tpu.vector_store %arg7[%c0_19, %c6, %c0_20], %34 {strides = array<i32>} : memref<16x16x16xf32, #tpu.memory_space<vmem>>, vector<16x1x16xf32>,
    %35 = vector.extract_strided_slice %6 {offsets = [0, 112], sizes = [16, 16], strides = [1, 1]} : vector<16x256xf32> to vector<16x16xf32>
    %c0_21 = arith.constant 0 : index
    %c7 = arith.constant 7 : index
    %c0_22 = arith.constant 0 : index
    %36 = vector.load %arg7[%c0_21, %c7, %c0_22] : memref<16x16x16xf32, #tpu.memory_space<vmem>>, vector<16x1x16xf32>
    %37 = vector.shape_cast %36 : vector<16x1x16xf32> to vector<16x16xf32>
    %38 = vector.shape_cast %35 : vector<16x16xf32> to vector<16x1x16xf32>
    tpu.vector_store %arg7[%c0_21, %c7, %c0_22], %38 {strides = array<i32>} : memref<16x16x16xf32, #tpu.memory_space<vmem>>, vector<16x1x16xf32>,
    %39 = vector.extract_strided_slice %6 {offsets = [0, 128], sizes = [16, 16], strides = [1, 1]} : vector<16x256xf32> to vector<16x16xf32>
    %c0_23 = arith.constant 0 : index
    %c8 = arith.constant 8 : index
    %c0_24 = arith.constant 0 : index
    %40 = vector.load %arg7[%c0_23, %c8, %c0_24] : memref<16x16x16xf32, #tpu.memory_space<vmem>>, vector<16x1x16xf32>
    %41 = vector.shape_cast %40 : vector<16x1x16xf32> to vector<16x16xf32>
    %42 = vector.shape_cast %39 : vector<16x16xf32> to vector<16x1x16xf32>
    tpu.vector_store %arg7[%c0_23, %c8, %c0_24], %42 {strides = array<i32>} : memref<16x16x16xf32, #tpu.memory_space<vmem>>, vector<16x1x16xf32>,
    %43 = vector.extract_strided_slice %6 {offsets = [0, 144], sizes = [16, 16], strides = [1, 1]} : vector<16x256xf32> to vector<16x16xf32>
    %c0_25 = arith.constant 0 : index
    %c9 = arith.constant 9 : index
    %c0_26 = arith.constant 0 : index
    %44 = vector.load %arg7[%c0_25, %c9, %c0_26] : memref<16x16x16xf32, #tpu.memory_space<vmem>>, vector<16x1x16xf32>
    %45 = vector.shape_cast %44 : vector<16x1x16xf32> to vector<16x16xf32>
    %46 = vector.shape_cast %43 : vector<16x16xf32> to vector<16x1x16xf32>
    tpu.vector_store %arg7[%c0_25, %c9, %c0_26], %46 {strides = array<i32>} : memref<16x16x16xf32, #tpu.memory_space<vmem>>, vector<16x1x16xf32>,
    %47 = vector.extract_strided_slice %6 {offsets = [0, 160], sizes = [16, 16], strides = [1, 1]} : vector<16x256xf32> to vector<16x16xf32>
    %c0_27 = arith.constant 0 : index
    %c10 = arith.constant 10 : index
    %c0_28 = arith.constant 0 : index
    %48 = vector.load %arg7[%c0_27, %c10, %c0_28] : memref<16x16x16xf32, #tpu.memory_space<vmem>>, vector<16x1x16xf32>
    %49 = vector.shape_cast %48 : vector<16x1x16xf32> to vector<16x16xf32>
    %50 = vector.shape_cast %47 : vector<16x16xf32> to vector<16x1x16xf32>
    tpu.vector_store %arg7[%c0_27, %c10, %c0_28], %50 {strides = array<i32>} : memref<16x16x16xf32, #tpu.memory_space<vmem>>, vector<16x1x16xf32>,
    %51 = vector.extract_strided_slice %6 {offsets = [0, 176], sizes = [16, 16], strides = [1, 1]} : vector<16x256xf32> to vector<16x16xf32>
    %c0_29 = arith.constant 0 : index
    %c11 = arith.constant 11 : index
    %c0_30 = arith.constant 0 : index
    %52 = vector.load %arg7[%c0_29, %c11, %c0_30] : memref<16x16x16xf32, #tpu.memory_space<vmem>>, vector<16x1x16xf32>
    %53 = vector.shape_cast %52 : vector<16x1x16xf32> to vector<16x16xf32>
    %54 = vector.shape_cast %51 : vector<16x16xf32> to vector<16x1x16xf32>
    tpu.vector_store %arg7[%c0_29, %c11, %c0_30], %54 {strides = array<i32>} : memref<16x16x16xf32, #tpu.memory_space<vmem>>, vector<16x1x16xf32>,
    %55 = vector.extract_strided_slice %6 {offsets = [0, 192], sizes = [16, 16], strides = [1, 1]} : vector<16x256xf32> to vector<16x16xf32>
    %c0_31 = arith.constant 0 : index
    %c12 = arith.constant 12 : index
    %c0_32 = arith.constant 0 : index
    %56 = vector.load %arg7[%c0_31, %c12, %c0_32] : memref<16x16x16xf32, #tpu.memory_space<vmem>>, vector<16x1x16xf32>
    %57 = vector.shape_cast %56 : vector<16x1x16xf32> to vector<16x16xf32>
    %58 = vector.shape_cast %55 : vector<16x16xf32> to vector<16x1x16xf32>
    tpu.vector_store %arg7[%c0_31, %c12, %c0_32], %58 {strides = array<i32>} : memref<16x16x16xf32, #tpu.memory_space<vmem>>, vector<16x1x16xf32>,
    %59 = vector.extract_strided_slice %6 {offsets = [0, 208], sizes = [16, 16], strides = [1, 1]} : vector<16x256xf32> to vector<16x16xf32>
    %c0_33 = arith.constant 0 : index
    %c13 = arith.constant 13 : index
    %c0_34 = arith.constant 0 : index
    %60 = vector.load %arg7[%c0_33, %c13, %c0_34] : memref<16x16x16xf32, #tpu.memory_space<vmem>>, vector<16x1x16xf32>
    %61 = vector.shape_cast %60 : vector<16x1x16xf32> to vector<16x16xf32>
    %62 = vector.shape_cast %59 : vector<16x16xf32> to vector<16x1x16xf32>
    tpu.vector_store %arg7[%c0_33, %c13, %c0_34], %62 {strides = array<i32>} : memref<16x16x16xf32, #tpu.memory_space<vmem>>, vector<16x1x16xf32>,
    %63 = vector.extract_strided_slice %6 {offsets = [0, 224], sizes = [16, 16], strides = [1, 1]} : vector<16x256xf32> to vector<16x16xf32>
    %c0_35 = arith.constant 0 : index
    %c14 = arith.constant 14 : index
    %c0_36 = arith.constant 0 : index
    %64 = vector.load %arg7[%c0_35, %c14, %c0_36] : memref<16x16x16xf32, #tpu.memory_space<vmem>>, vector<16x1x16xf32>
    %65 = vector.shape_cast %64 : vector<16x1x16xf32> to vector<16x16xf32>
    %66 = vector.shape_cast %63 : vector<16x16xf32> to vector<16x1x16xf32>
    tpu.vector_store %arg7[%c0_35, %c14, %c0_36], %66 {strides = array<i32>} : memref<16x16x16xf32, #tpu.memory_space<vmem>>, vector<16x1x16xf32>,
    %67 = vector.extract_strided_slice %6 {offsets = [0, 240], sizes = [16, 16], strides = [1, 1]} : vector<16x256xf32> to vector<16x16xf32>
    %c0_37 = arith.constant 0 : index
    %c15 = arith.constant 15 : index
    %c0_38 = arith.constant 0 : index
    %68 = vector.load %arg7[%c0_37, %c15, %c0_38] : memref<16x16x16xf32, #tpu.memory_space<vmem>>, vector<16x1x16xf32>
    %69 = vector.shape_cast %68 : vector<16x1x16xf32> to vector<16x16xf32>
    %70 = vector.shape_cast %67 : vector<16x16xf32> to vector<16x1x16xf32>
    tpu.vector_store %arg7[%c0_37, %c15, %c0_38], %70 {strides = array<i32>} : memref<16x16x16xf32, #tpu.memory_space<vmem>>, vector<16x1x16xf32>,
    %c0_39 = arith.constant 0 : index
    %c0_40 = arith.constant 0 : index
    %c0_41 = arith.constant 0 : index
    %71 = vector.load %arg7[%c0_39, %c0_40, %c0_41] : memref<16x16x16xf32, #tpu.memory_space<vmem>>, vector<16x16x16xf32>
    %72 = vector.shape_cast %71 : vector<16x16x16xf32> to vector<256x16xf32>
    %c0_42 = arith.constant 0 : index
    %c0_43 = arith.constant 0 : index
    %73 = vector.load %arg5[%c0_42, %c0_43] : memref<16x64xf32, #tpu.memory_space<vmem>>, vector<16x64xf32>
    %cst_44 = arith.constant dense<0.000000e+00> : vector<256x64xf32>
    %74 = tpu.matmul %72, %73, %cst_44 {dimension_numbers = #tpu.dot_dimension_numbers<[1], [0], [0], [1], [0, 0, 1, 1], [], []>, precision = #tpu.contract_precision<fp32>} : vector<256x16xf32>, vector<16x64xf32>, vector<256x64xf32> -> vector<256x64xf32>
    %75 = vector.extract_strided_slice %74 {offsets = [0, 0], sizes = [64, 32], strides = [1, 1]} : vector<256x64xf32> to vector<64x32xf32>
    %76 = vector.extract_strided_slice %74 {offsets = [64, 32], sizes = [64, 32], strides = [1, 1]} : vector<256x64xf32> to vector<64x32xf32>
    %77 = arith.addf %75, %76 : vector<64x32xf32>
    %78 = vector.extract_strided_slice %74 {offsets = [128, 0], sizes = [64, 32], strides = [1, 1]} : vector<256x64xf32> to vector<64x32xf32>
    %79 = vector.extract_strided_slice %74 {offsets = [192, 32], sizes = [64, 32], strides = [1, 1]} : vector<256x64xf32> to vector<64x32xf32>
    %80 = arith.addf %78, %79 : vector<64x32xf32>
    %81 = vector.shape_cast %77 : vector<64x32xf32> to vector<4x16x32xf32>
    %c0_45 = arith.constant 0 : index
    %c0_46 = arith.constant 0 : index
    %c0_47 = arith.constant 0 : index
    %c0_48 = arith.constant 0 : index
    %82 = vector.load %arg6[%c0_45, %c0_46, %c0_47, %c0_48] : memref<1x4x16x64xf32, #tpu.memory_space<vmem>>, vector<1x4x16x32xf32>
    %83 = vector.shape_cast %82 : vector<1x4x16x32xf32> to vector<4x16x32xf32>
    %84 = vector.shape_cast %81 : vector<4x16x32xf32> to vector<1x4x16x32xf32>
    tpu.vector_store %arg6[%c0_45, %c0_46, %c0_47, %c0_48], %84 {strides = array<i32>} : memref<1x4x16x64xf32, #tpu.memory_space<vmem>>, vector<1x4x16x32xf32>,
    %85 = vector.shape_cast %80 : vector<64x32xf32> to vector<4x16x32xf32>
    %c0_49 = arith.constant 0 : index
    %c0_50 = arith.constant 0 : index
    %c0_51 = arith.constant 0 : index
    %c32 = arith.constant 32 : index
    %86 = vector.load %arg6[%c0_49, %c0_50, %c0_51, %c32] : memref<1x4x16x64xf32, #tpu.memory_space<vmem>>, vector<1x4x16x32xf32>
    %87 = vector.shape_cast %86 : vector<1x4x16x32xf32> to vector<4x16x32xf32>
    %88 = vector.shape_cast %85 : vector<4x16x32xf32> to vector<1x4x16x32xf32>
    tpu.vector_store %arg6[%c0_49, %c0_50, %c0_51, %c32], %88 {strides = array<i32>} : memref<1x4x16x64xf32, #tpu.memory_space<vmem>>, vector<1x4x16x32xf32>,
    return
  }
  func.func @transform_0(%arg0: i32, %arg1: i32) -> (i32, i32, i32) {
    %c0_i32 = arith.constant 0 : i32
    %c0_i32_0 = arith.constant 0 : i32
    return %arg0, %c0_i32, %arg1 : i32, i32, i32
  }
  func.func @transform_1(%arg0: i32, %arg1: i32) -> (i32, i32) {
    %c0_i32 = arith.constant 0 : i32
    %c0_i32_0 = arith.constant 0 : i32
    %c0_i32_1 = arith.constant 0 : i32
    return %c0_i32, %c0_i32_0 : i32, i32
  }
  func.func @transform_2(%arg0: i32, %arg1: i32) -> (i32, i32) {
    %c0_i32 = arith.constant 0 : i32
    %c0_i32_0 = arith.constant 0 : i32
    %c0_i32_1 = arith.constant 0 : i32
    return %c0_i32, %c0_i32_0 : i32, i32
  }
  func.func @transform_3(%arg0: i32, %arg1: i32) -> (i32, i32) {
    %c0_i32 = arith.constant 0 : i32
    %c0_i32_0 = arith.constant 0 : i32
    %c0_i32_1 = arith.constant 0 : i32
    return %c0_i32, %c0_i32_0 : i32, i32
  }
  func.func @transform_4(%arg0: i32, %arg1: i32) -> (i32, i32, i32, i32) {
    %c0_i32 = arith.constant 0 : i32
    %c0_i32_0 = arith.constant 0 : i32
    %c0_i32_1 = arith.constant 0 : i32
    return %arg0, %c0_i32, %arg1, %c0_i32_0 : i32, i32, i32, i32
  }
}

</mosaic_0001>

<bundles_post_ra>
// kernel: tpu_custom_call.1
= control target key start
LH: loop header
LB: loop body
LE: loop exit
PB: predicated region body
PF: predicated region fallthrough
CT: control target
= control target key end

     0   :  { %9 = vsyncpa [#allocation4], 0  ;;  %s6677_s0 = inlined_call_operand.vmem [shape: f32[2,8,256], index: 0, kind: input, shape index: {}]   ;;  %s6678_s1 = inlined_call_operand.vmem [shape: f32[16,8], index: 1, kind: input, shape index: {}]   ;;  %s6679_s2 = inlined_call_operand.vmem [shape: f32[16,1], index: 2, kind: input, shape index: {}]   ;;  %s6680_s3 = inlined_call_operand.vmem [shape: f32[16,64], index: 3, kind: input, shape index: {}]   ;;  %s6681_s4 = inlined_call_operand.hbm [shape: f32[2,4,16,64], index: 4, kind: output, shape index: {}]  }
   0x1   :  { %11 = vsyncpa [#allocation4 + $0x1], 0  ;;  %s5128_s15 = smov 0   ;;  %s5130_s16 = smov 0  }
   0x2   :  { %s5132_s17 = smov 0   ;;  %s5134_s18 = smov 0  }
   0x3   :  { %s5136_s19 = smov 0   ;;  %s5138_s20 = smov 0  }
   0x4 LB: > { %s4201_s21 = sadd.s32 4294967295, %s5088_s20   ;;  %s4202_s22 = sadd.s32 4294967294, %s5088_s20   ;;  %s5088_s20 = sphi %s5138_s20, %s17_s20   ;;  %s5084_s19 = sphi %s5136_s19, %s6735_s19   ;;  %s5080_s18 = sphi %s5134_s18, %s6734_s18   ;;  %s5076_s17 = sphi %s5132_s17, %s6733_s17   ;;  %s5072_s16 = sphi %s5130_s16, %s6732_s16   ;;  %s5068_s15 = sphi %s5128_s15, %s6731_s15  }
   0x5   : > { %s29_s23 = sadd.s32 1, %s5084_s19  ;;  %s129_s24 = sadd.s32 1, %s5076_s17 }
   0x6   : > { %p31_p0 = scmp.ge.s32.totalorder %s29_s23, 2  ;;  %p139_p1 = scmp.ne.s32.totalorder %s5076_s17, %s5072_s16 }
   0x7   : > { %p140_p2 = scmp.eq.s32.totalorder %s4201_s21, 1  ;;  %p145_p3 = scmp.ne.s32.totalorder %s5072_s16, %s5068_s15 }
   0x8   : > { %s6737_s23 = smov (%p31_p0, %s29_s23), 0  ;;  %p146_p5 = scmp.eq.s32.totalorder %s4202_s22, 1 }
   0x9   : > { %p5168_p4 = por %p140_p2, %p139_p1  ;;  %s124_s26 = ssub.s32 %s5084_s19, %s6737_s23 }
   0xa   : > { %p4205_p6 = scmp.ge.s32.totalorder %s5088_s20, 1  ;;  %p127_p7 = scmp.eq.s32.totalorder %s124_s26, 0 }
   0xb   : > { %p5175_p8 = por %p146_p5, %p145_p3  ;;  %p186_p9 = scmp.lt.s32.totalorder %s5088_s20, 3 }
   0xc   : > { %s5181_s28 = scalar_select %p127_p7, %s5076_s17, %s129_s24  }
   0xd   : > { %p187_p10 = pnand %p4205_p6, %p186_p9 }
   0xf   : > { %190 = sbr.rel (%p187_p10) target bundleno = 1487 (0x5cf), region = 36 }
  0x16   : > { %p217_p11 = scmp.lt.s32.totalorder %s5080_s18, 1  ;;  %v229_v0 = vld [vmem:[%s6678_s1] sm:$0xff]  ;;  %vm243_vm0 = vcmask 64512   ;;  %v230_v1 = vld [vmem:[%s6678_s1 + $0x8] sm:$0xff]  ;;  %v5090_v2 = vmov 0.0   ;;  %v5091_v5 = vmov 0   ;;  %v770_v32 = vlaneseq }
  0x17   : > { %316 = vmatprep.mubr.f32.mxu0 %v5090_v2  ;;  %v245_v3 = vsel %vm243_vm0, %v229_v0, 0  ;;  %v248_v4 = vsel %vm243_vm0, %v230_v1, 0  ;;  %5009 = vset.pattern.permute.xlu0 %v5091_v5  ;;  %v232_v6 = vld [vmem:[%s6679_s2 + $0x8] sm:$0xff]  ;;  %v231_v9 = vld [vmem:[%s6679_s2] sm:$0xff]  ;;  %v5092_v30 = vmov 1966171168  }
  0x18   : > { %s218_s9 = scalar_select %p217_p11, %s5080_s18, 1  ;;  %v317_v7 = vand.u32 4294901760, %v245_v3  ;;  %v328_v8 = vand.u32 4294901760, %v248_v4  ;;  %240 = vperm.xlu0 %5009, %v232_v6   ;;  %v768_v31 = vunpack.c.l.s4 %v5092_v30  ;;  %v771_v35 = vshrl.u32 %v770_v32, 7 }
  0x19   : > { %vm880_vm1 = vcmask 122880   ;;  %s5093_s22 = smov 96   ;;  %s5094_s24 = smov 112   ;;  %vm2087_vm2 = vcmask 130048   ;;  %vm4056_vm3 = vcmask 261120   ;;  %vm4097_vm4 = vcmask 523520  }
  0x1a   : > { %s4214_s12 = sshll.u32 %s218_s9, 4  ;;  %v318_v10 = vsub.f32 %v245_v3, %v317_v7  ;;  %v329_v11 = vsub.f32 %v248_v4, %v328_v8  ;;  %v769_v34 = vunpack.c.0.s8 %v768_v31  ;;  %v5215_v44 = vsub.s32 0, %v771_v35  ;;  %s5095_s26 = smov 64  }
  0x1b   : > { %s224_s21 = scalar_lea.vmem %s6677_s0, %s4214_s12  ;;  %s5096_s29 = smov 80  }
  0x1c   : > { %v228_v12 = vld [vmem:[%s224_s21 + $0x8] sm:$0xff]  ;;  %v227_v13 = vld [vmem:[%s224_s21] sm:$0xff]  ;;  %v319_v14 = vand.u32 4294901760, %v318_v10  ;;  %v330_v15 = vand.u32 4294901760, %v329_v11  ;;  %235 = vperm.xlu0 %5009, %v231_v9   ;;  %v5212_v36 = vsub.s32 %v769_v34, %v771_v35  ;;  %s5097_s30 = smov 32   ;;  %s5098_s5 = smov 48  }
  0x1d   : > { %v250_v16 = vand.u32 4294901760, %v228_v12  ;;  %v252_v17 = vand.u32 4294901760, %v227_v13  ;;  %s5099_s6 = smov 16   ;;  %s213_s11 = sand.u32 1, %s5072_s16  }
  0x1e   : > { %v320_v18 = vsub.f32 %v318_v10, %v319_v14  ;;  %v331_v19 = vsub.f32 %v329_v11, %v330_v15  ;;  %s4206_s12 = sshll.u32 %s213_s11, 6  ;;  %s4215_s14 = sshll.u32 %s5080_s18, 10 }
  0x1f   : > { %251 = vmatprep.subr.mxu0 %v250_v16  ;;  %v346_v20 = vsub.f32 %v227_v13, %v252_v17  ;;  %v340_v21 = vsub.f32 %v228_v12, %v250_v16  ;;  %s6580_s13 = scalar_lea.vmem [#allocation3], %s4206_s12  ;;  %s6631_s18 = scalar_lea.sflag [#allocation4], %s213_s11 }
  0x20   : > { %253 = vmatpush1.msra.mxu0 %v252_v17  ;;  %v321_v22 = vand.u32 4294901760, %v320_v18  ;;  %v332_v25 = vand.u32 4294901760, %v331_v19  ;;  %s4122_s21 = sshll.u32 %s6580_s13, 4  ;;  %s6623_s21 = int_to_ptr.vmem [resolvable:$true] %s4122_s21 }
  0x21   : > { %v341_v23 = vand.u32 4294901760, %v340_v21  ;;  %v347_v24 = vand.u32 4294901760, %v346_v20 }
  0x22   : > { %322 = vmatmul.mubr.f32.vlgmr.msra.gmra.mrb[0].mxu0 %v321_v22 }
  0x23   : > { %327 = vmatprep.mubr.f32.mxu0 %v5090_v2  ;;  %v342_v26 = vsub.f32 %v340_v21, %v341_v23  ;;  %v348_v27 = vsub.f32 %v346_v20, %v347_v24 }
  0x25   : > { %v343_v28 = vand.u32 4294901760, %v342_v26  ;;  %v349_v29 = vand.u32 4294901760, %v348_v27 }
  0x26   : > { %333 = vmatmul.mubr.f32.gmra.mrb[2].mxu0 %v332_v25 }
  0x27   : > { %344 = vmatprep.subr.mxu0 %v343_v28  ;;  %413 = vmatprep.mubr.f32.mxu0 %v5090_v2 }
  0x28   : > { %350 = vmatpush1.msra.mxu0 %v349_v29 }
  0x29   : > { %430 = vmatprep.subr.mxu0 %v340_v21 }
  0x2a   : > { %415 = vmatmul.mubr.f32.vlgmr.msra.gmra.mrb[0].mxu0 %v317_v7 }
  0x2b   : > { %420 = vmatprep.mubr.f32.mxu0 %v5090_v2  ;;  %433 = vmatpush1.msra.mxu0 %v346_v20 }
  0x2c   : > { %514 = vmatprep.subr.mxu0 %v250_v16 }
  0x2e   : > { %422 = vmatmul.mubr.f32.gmra.mrb[2].mxu0 %v328_v8 }
  0x2f   : > { %496 = vmatprep.mubr.f32.mxu0 %v5090_v2 }
  0x32   : > { %499 = vmatmul.mubr.f32.vlgmr.msra.gmra.mrb[0].mxu0 %v318_v10 }
  0x33   : > { %504 = vmatprep.mubr.f32.mxu0 %v5090_v2  ;;  %516 = vmatpush1.msra.mxu0 %v252_v17 }
  0x34   : > { %601 = vmatprep.subr.mxu0 %v341_v23 }
  0x36   : > { %507 = vmatmul.mubr.f32.gmra.mrb[2].mxu0 %v329_v11 }
  0x37   : > { %579 = vmatprep.mubr.f32.mxu0 %v5090_v2 }
  0x3a   : > { %583 = vmatmul.mubr.f32.vlgmr.msra.gmra.mrb[0].mxu0 %v319_v14 }
  0x3b   : > { %588 = vmatprep.mubr.f32.mxu0 %v5090_v2  ;;  %605 = vmatpush1.msra.mxu0 %v347_v24 }
  0x3c   : > { %684 = vmatprep.subr.mxu0 %v250_v16 }
  0x3e   : > { %592 = vmatmul.mubr.f32.gmra.mrb[2].mxu0 %v330_v15 }
  0x3f   : > { %668 = vmatprep.mubr.f32.mxu0 %v5090_v2 }
  0x42   : > { %670 = vmatmul.mubr.f32.vlgmr.msra.gmra.mrb[0].mxu0 %v317_v7 }
  0x43   : > { %675 = vmatprep.mubr.f32.mxu0 %v5090_v2  ;;  %686 = vmatpush1.msra.mxu0 %v252_v17 }
  0x46   : > { %677 = vmatmul.mubr.f32.gmra.mrb[2].mxu0 %v328_v8 }
  0x47   : > { %749 = vmatprep.mubr.f32.mxu0 %v5090_v2 }
  0x4a   : > { %751 = vmatmul.mubr.f32.vlgmr.msra.gmra.mrb[0].mxu0 %v317_v7 }
  0x4b   : > { %756 = vmatprep.mubr.f32.mxu0 %v5090_v2 }
  0x4e   : > { %758 = vmatmul.mubr.f32.gmra.mrb[2].mxu0 %v328_v8 }
  0x97   : > { %v241_v33 = vpop.permute.xlu0 %240 }
  0x9b   : > { %v236_v37 = vpop.permute.xlu0 %235 }
 0x11d   : > { %v752_v38 = vpop.f32.mrb[0].mxu0 }
 0x11e   : > { %v4758_v39 = vadd.f32 %v752_v38, %v236_v37  ;;  %v754_v40 = vpop.f32.mrb[1].mxu0 }
 0x11f   : > { %v4759_v41 = vadd.f32 %v754_v40, %v236_v37 }
 0x120   : > { %v766_v42 = vcombine.high %v4758_v39, %v4758_v39  ;;  %v773_v43 = vrot.slane %v4758_v39, %v5212_v36 }
 0x121   : > { %v1411_v45 = vcombine.high %v4759_v41, %v4759_v41  ;;  %v1418_v46 = vrot.slane %v4759_v41, %v5212_v36  ;;  %v759_v47 = vpop.f32.mrb[2].mxu0 }
 0x122   : > { %v780_v48 = vrot.slane %v766_v42, %v5212_v36  ;;  %v781_v49 = vcombine.high %v773_v43, %v773_v43  ;;  %v789_v50 = vrot.slane %v773_v43, %v5212_v36  ;;  %v761_v51 = vpop.f32.mrb[3].mxu0  ;;  %v4760_v2 = vadd.f32 %v759_v47, %v241_v33 }
 0x123   : > { %v1425_v52 = vrot.slane %v1411_v45, %v5212_v36  ;;  %v1426_v53 = vcombine.high %v1418_v46, %v1418_v46  ;;  %v5222_v54 = vrot.slane %v1418_v46, %v5212_v36  ;;  %v4761_v6 = vadd.f32 %v761_v51, %v241_v33 }
 0x124   : > { %v782_v55 = vcombine.high %v780_v48, %v780_v48  ;;  %v796_v56 = vrot.slane %v780_v48, %v5212_v36  ;;  %v5226_v57 = vrot.slane %v781_v49, %v5212_v36  ;;  %v5228_v58 = vcombine.high %v789_v50, %v789_v50  ;;  %881 = vst.msk [vmem:[#allocation2] sm:$0x1] %vm880_vm1, %v789_v50 }
 0x125   : > { %v5232_v59 = vrot.slane %v789_v50, %v5215_v44  ;;  %v1427_v60 = vcombine.high %v1425_v52, %v1425_v52  ;;  %v1441_v61 = vrot.slane %v1425_v52, %v5212_v36  ;;  %v5236_v62 = vrot.slane %v1426_v53, %v5212_v36  ;;  %1525 = vst.msk [vmem:[#allocation2 + $0x8] sm:$0x1] %vm880_vm1, %v5222_v54 }
 0x126   : > { %v810_v63 = vrot.slane %v782_v55, %v5212_v36  ;;  %v812_v0 = vcombine.high %v796_v56, %v796_v56  ;;  %v813_v1 = vcombine.high %v5226_v57, %v5226_v57  ;;  %882 = vst.msk [vmem:[#allocation2 + $0x10] sm:$0x1] %vm880_vm1, %v5226_v57  ;;  %883 = vst.msk [vmem:[#allocation2 + $0x20] sm:$0x1] %vm880_vm1, %v5228_v58 }
 0x127   : > { %885 = vst.msk [vmem:[#allocation2 + $0x40] sm:$0x1] %vm880_vm1, %v796_v56  ;;  %v5249_v3 = vrot.slane %v796_v56, %v5215_v44  ;;  %v1455_v4 = vrot.slane %v1427_v60, %v5212_v36  ;;  %v1456_v5 = vcombine.high %v5222_v54, %v5222_v54  ;;  %1526 = vst.msk [vmem:[#allocation2 + $0x18] sm:$0x1] %vm880_vm1, %v5236_v62  ;;  %1025 = vrot.lane.b32.xlu1 %v5232_v59, %s5093_s22 }
 0x128   : > { %1529 = vst.msk [vmem:[#allocation2 + $0x48] sm:$0x1] %vm880_vm1, %v1441_v61  ;;  %v814_v7 = vcombine.high %v810_v63, %v810_v63  ;;  %884 = vst.msk [vmem:[#allocation2 + $0x30] sm:$0x1] %vm880_vm1, %v813_v1  ;;  %v5263_v8 = vrot.slane %v813_v1, %v5215_v44  ;;  %v5266_v9 = vrot.slane %v810_v63, %v5215_v44  ;;  %961 = vrot.lane.b32.xlu0 %v5232_v59, %s5094_s24 }
 0x129   : > { %886 = vst.msk [vmem:[#allocation2 + $0x50] sm:$0x1] %vm880_vm1, %v810_v63  ;;  %887 = vst.msk [vmem:[#allocation2 + $0x60] sm:$0x1] %vm880_vm1, %v812_v0  ;;  %v5269_v10 = vrot.slane %v812_v0, %v5215_v44  ;;  %v1457_v11 = vcombine.high %v1441_v61, %v1441_v61  ;;  %v1458_v12 = vcombine.high %v5236_v62, %v5236_v62 }
 0x12a   : > { %v1459_v13 = vcombine.high %v1455_v4, %v1455_v4  ;;  %1527 = vst.msk [vmem:[#allocation2 + $0x28] sm:$0x1] %vm880_vm1, %v1456_v5  ;;  %1530 = vst.msk [vmem:[#allocation2 + $0x58] sm:$0x1] %vm880_vm1, %v1455_v4  ;;  %v5279_v14 = vrot.slane %v814_v7, %v5215_v44  ;;  %v5282_v15 = vrot.slane %v1456_v5, %v5215_v44  ;;  %v5400_v5 = vld [vmem:[%s6680_s3] sm:$0xff] }
 0x12b   : > { %888 = vst.msk [vmem:[#allocation2 + $0x70] sm:$0x1] %vm880_vm1, %v814_v7  ;;  %v5285_v16 = vrot.slane %v1441_v61, %v5215_v44  ;;  %1528 = vst.msk [vmem:[#allocation2 + $0x38] sm:$0x1] %vm880_vm1, %v1458_v12  ;;  %v5291_v17 = vrot.slane %v1458_v12, %v5215_v44  ;;  %v5294_v18 = vrot.slane %v1455_v4, %v5215_v44  ;;  %1153 = vrot.lane.b32.xlu1 %v5232_v59, %s5095_s26 }
 0x12c   : > { %1531 = vst.msk [vmem:[#allocation2 + $0x68] sm:$0x1] %vm880_vm1, %v1457_v11  ;;  %1532 = vst.msk [vmem:[#allocation2 + $0x78] sm:$0x1] %vm880_vm1, %v1459_v13  ;;  %v5297_v19 = vrot.slane %v1457_v11, %v5215_v44  ;;  %v5300_v20 = vrot.slane %v1459_v13, %v5215_v44  ;;  %v815_v21 = vcombine.high %v4760_v2, %v4760_v2  ;;  %1089 = vrot.lane.b32.xlu0 %v5232_v59, %s5096_s29 }
 0x12d   : > { %v822_v22 = vrot.slane %v4760_v2, %v5212_v36  ;;  %v1460_v23 = vcombine.high %v4761_v6, %v4761_v6  ;;  %v1467_v24 = vrot.slane %v4761_v6, %v5212_v36  ;;  %v1544_v29 = vrot.slane %v5222_v54, %v5215_v44  ;;  %v5405_v6 = vld [vmem:[%s6680_s3 + $0x8] sm:$0xff] }
 0x12e   : > { %v829_v25 = vrot.slane %v815_v21, %v5212_v36  ;;  %v904_v7 = vrot.slane %v5226_v57, %v5215_v44  ;;  %v2185_v11 = vand.u32 4294901760, %v5400_v5  ;;  %v2188_v12 = vand.u32 4294901760, %v5405_v6 }
 0x12f   : > { %v830_v26 = vcombine.high %v822_v22, %v822_v22  ;;  %v838_v27 = vrot.slane %v822_v22, %v5212_v36  ;;  %v1474_v28 = vrot.slane %v1460_v23, %v5212_v36  ;;  %v1475_v30 = vcombine.high %v1467_v24, %v1467_v24  ;;  %1281 = vrot.lane.b32.xlu1 %v5232_v59, %s5097_s30 }
 0x130   : > { %v1483_v31 = vrot.slane %v1467_v24, %v5212_v36  ;;  %v831_v32 = vcombine.high %v829_v25, %v829_v25  ;;  %v845_v33 = vrot.slane %v829_v25, %v5212_v36  ;;  %1217 = vrot.lane.b32.xlu0 %v5232_v59, %s5098_s5  ;;  %v5416_v13 = vpack.c.bf16 %v2188_v12, %v2185_v11 }
 0x131   : > { %v852_v34 = vrot.slane %v830_v26, %v5212_v36  ;;  %v860_v35 = vcombine.high %v838_v27, %v838_v27  ;;  %889 = vst.msk [vmem:[#allocation2 + $0x80] sm:$0x1] %vm880_vm1, %v838_v27  ;;  %v5322_v37 = vrot.slane %v838_v27, %v5215_v44  ;;  %v1476_v38 = vcombine.high %v1474_v28, %v1474_v28 }
 0x132   : > { %v1490_v39 = vrot.slane %v1474_v28, %v5212_v36  ;;  %v1497_v40 = vrot.slane %v1475_v30, %v5212_v36  ;;  %1533 = vst.msk [vmem:[#allocation2 + $0x88] sm:$0x1] %vm880_vm1, %v1483_v31  ;;  %v859_v41 = vrot.slane %v831_v32, %v5212_v36  ;;  %v861_v42 = vcombine.high %v845_v33, %v845_v33 }
 0x133   : > { %v862_v43 = vcombine.high %v852_v34, %v852_v34  ;;  %890 = vst.msk [vmem:[#allocation2 + $0x90] sm:$0x1] %vm880_vm1, %v852_v34  ;;  %891 = vst.msk [vmem:[#allocation2 + $0xa0] sm:$0x1] %vm880_vm1, %v860_v35  ;;  %v5332_v45 = vrot.slane %v852_v34, %v5215_v44  ;;  %v5335_v46 = vrot.slane %v860_v35, %v5215_v44  ;;  %1605 = vrot.lane.b32.xlu1 %v1544_v29, %s5094_s24 }
 0x134   : > { %893 = vst.msk [vmem:[#allocation2 + $0xc0] sm:$0x1] %vm880_vm1, %v845_v33  ;;  %v5338_v47 = vrot.slane %v845_v33, %v5215_v44  ;;  %v1504_v48 = vrot.slane %v1476_v38, %v5212_v36  ;;  %v1505_v49 = vcombine.high %v1483_v31, %v1483_v31  ;;  %1534 = vst.msk [vmem:[#allocation2 + $0x98] sm:$0x1] %vm880_vm1, %v1497_v40  ;;  %1345 = vrot.lane.b32.xlu0 %v5232_v59, %s5099_s6 }
 0x135   : > { %1537 = vst.msk [vmem:[#allocation2 + $0xc8] sm:$0x1] %vm880_vm1, %v1490_v39  ;;  %v863_v50 = vcombine.high %v859_v41, %v859_v41  ;;  %892 = vst.msk [vmem:[#allocation2 + $0xb0] sm:$0x1] %vm880_vm1, %v862_v43  ;;  %v5348_v51 = vrot.slane %v862_v43, %v5215_v44  ;;  %v5351_v52 = vrot.slane %v859_v41, %v5215_v44  ;;  %4733 = vmatprep.subr.bf16.mxu0 %v5416_v13 }
 0x136   : > { %894 = vst.msk [vmem:[#allocation2 + $0xd0] sm:$0x1] %vm880_vm1, %v859_v41  ;;  %895 = vst.msk [vmem:[#allocation2 + $0xe0] sm:$0x1] %vm880_vm1, %v861_v42  ;;  %v5354_v36 = vrot.slane %v861_v42, %v5215_v44  ;;  %v1506_v53 = vcombine.high %v1490_v39, %v1490_v39  ;;  %v1507_v54 = vcombine.high %v1497_v40, %v1497_v40  ;;  %4735 = vmatpush3.bf16.msra.mxu0 %v5416_v13 }
 0x137   : > { %v1508_v55 = vcombine.high %v1504_v48, %v1504_v48  ;;  %1535 = vst.msk [vmem:[#allocation2 + $0xa8] sm:$0x1] %vm880_vm1, %v1505_v49  ;;  %1538 = vst.msk [vmem:[#allocation2 + $0xd8] sm:$0x1] %vm880_vm1, %v1504_v48  ;;  %v5361_v56 = vrot.slane %v1483_v31, %v5215_v44  ;;  %v5365_v60 = vrot.slane %v863_v50, %v5215_v44  ;;  %1733 = vrot.lane.b32.xlu1 %v1544_v29, %s5096_s29 }
 0x138   : > { %896 = vst.msk [vmem:[#allocation2 + $0xf0] sm:$0x1] %vm880_vm1, %v863_v50  ;;  %v5368_v61 = vrot.slane %v1497_v40, %v5215_v44  ;;  %v5371_v59 = vrot.slane %v1505_v49, %v5215_v44  ;;  %v5374_v63 = vrot.slane %v1490_v39, %v5215_v44  ;;  %1536 = vst.msk [vmem:[#allocation2 + $0xb8] sm:$0x1] %vm880_vm1, %v1507_v54  ;;  %1669 = vrot.lane.b32.xlu0 %v1544_v29, %s5093_s22 }
 0x139   : > { %1539 = vst.msk [vmem:[#allocation2 + $0xe8] sm:$0x1] %vm880_vm1, %v1506_v53  ;;  %1540 = vst.msk [vmem:[#allocation2 + $0xf8] sm:$0x1] %vm880_vm1, %v1508_v55  ;;  %v5380_v0 = vrot.slane %v1507_v54, %v5215_v44  ;;  %v5383_v1 = vrot.slane %v1504_v48, %v5215_v44  ;;  %v5386_v2 = vrot.slane %v1506_v53, %v5215_v44 }
 0x13a   : > { %v5389_v4 = vrot.slane %v1508_v55, %v5215_v44  ;;  %v908_v57 = vrot.slane %v5228_v58, %v5215_v44  ;;  %v1548_v21 = vrot.slane %v5236_v62, %v5215_v44  ;;  %v5561_v48 = vsub.f32 %v5405_v6, %v2188_v12 }
 0x13b   : > { %1861 = vrot.lane.b32.xlu1 %v1544_v29, %s5098_s5 }
 0x13c   : > { %1797 = vrot.lane.b32.xlu0 %v1544_v29, %s5095_s26 }
 0x13f   : > { %1989 = vrot.lane.b32.xlu1 %v1544_v29, %s5099_s6 }
 0x140   : > { %1925 = vrot.lane.b32.xlu0 %v1544_v29, %s5097_s30 }
 0x143   : > { %1027 = vrot.lane.b32.xlu1 %v904_v7, %s5093_s22 }
 0x144   : > { %963 = vrot.lane.b32.xlu0 %v904_v7, %s5094_s24 }
 0x147   : > { %1155 = vrot.lane.b32.xlu1 %v904_v7, %s5095_s26 }
 0x148   : > { %1091 = vrot.lane.b32.xlu0 %v904_v7, %s5096_s29 }
 0x14b   : > { %1283 = vrot.lane.b32.xlu1 %v904_v7, %s5097_s30 }
 0x14c   : > { %1219 = vrot.lane.b32.xlu0 %v904_v7, %s5098_s5 }
 0x14f   : > { %1029 = vrot.lane.b32.xlu1 %v908_v57, %s5093_s22 }
 0x150   : > { %1347 = vrot.lane.b32.xlu0 %v904_v7, %s5099_s6 }
 0x153   : > { %1157 = vrot.lane.b32.xlu1 %v908_v57, %s5095_s26 }
 0x154   : > { %965 = vrot.lane.b32.xlu0 %v908_v57, %s5094_s24 }
 0x157   : > { %1285 = vrot.lane.b32.xlu1 %v908_v57, %s5097_s30 }
 0x158   : > { %1093 = vrot.lane.b32.xlu0 %v908_v57, %s5096_s29 }
 0x15b   : > { %1607 = vrot.lane.b32.xlu1 %v1548_v21, %s5094_s24 }
 0x15c   : > { %1221 = vrot.lane.b32.xlu0 %v908_v57, %s5098_s5 }
 0x15f   : > { %1735 = vrot.lane.b32.xlu1 %v1548_v21, %s5096_s29 }
 0x160   : > { %1349 = vrot.lane.b32.xlu0 %v908_v57, %s5099_s6 }
 0x163   : > { %1863 = vrot.lane.b32.xlu1 %v1548_v21, %s5098_s5 }
 0x164   : > { %1671 = vrot.lane.b32.xlu0 %v1548_v21, %s5093_s22 }
 0x167   : > { %1991 = vrot.lane.b32.xlu1 %v1548_v21, %s5099_s6 }
 0x168   : > { %1799 = vrot.lane.b32.xlu0 %v1548_v21, %s5095_s26 }
 0x16b   : > { %1609 = vrot.lane.b32.xlu1 %v5282_v15, %s5094_s24 }
 0x16c   : > { %1927 = vrot.lane.b32.xlu0 %v1548_v21, %s5097_s30 }
 0x16f   : > { %1737 = vrot.lane.b32.xlu1 %v5282_v15, %s5096_s29 }
 0x170   : > { %1673 = vrot.lane.b32.xlu0 %v5282_v15, %s5093_s22 }
 0x173   : > { %1865 = vrot.lane.b32.xlu1 %v5282_v15, %s5098_s5 }
 0x174   : > { %1801 = vrot.lane.b32.xlu0 %v5282_v15, %s5095_s26 }
 0x177   : > { %1993 = vrot.lane.b32.xlu1 %v5282_v15, %s5099_s6 }
 0x178   : > { %1929 = vrot.lane.b32.xlu0 %v5282_v15, %s5097_s30 }
 0x17b   : > { %1031 = vrot.lane.b32.xlu1 %v5263_v8, %s5093_s22 }
 0x17c   : > { %967 = vrot.lane.b32.xlu0 %v5263_v8, %s5094_s24 }
 0x17f   : > { %1159 = vrot.lane.b32.xlu1 %v5263_v8, %s5095_s26 }
 0x180   : > { %1095 = vrot.lane.b32.xlu0 %v5263_v8, %s5096_s29 }
 0x183   : > { %1287 = vrot.lane.b32.xlu1 %v5263_v8, %s5097_s30 }
 0x184   : > { %1223 = vrot.lane.b32.xlu0 %v5263_v8, %s5098_s5 }
 0x187   : > { %1611 = vrot.lane.b32.xlu1 %v5291_v17, %s5094_s24 }
 0x188   : > { %1351 = vrot.lane.b32.xlu0 %v5263_v8, %s5099_s6 }
 0x18b   : > { %1739 = vrot.lane.b32.xlu1 %v5291_v17, %s5096_s29 }
 0x18c   : > { %1675 = vrot.lane.b32.xlu0 %v5291_v17, %s5093_s22 }
 0x18f   : > { %1867 = vrot.lane.b32.xlu1 %v5291_v17, %s5098_s5 }
 0x190   : > { %1803 = vrot.lane.b32.xlu0 %v5291_v17, %s5095_s26 }
 0x193   : > { %1995 = vrot.lane.b32.xlu1 %v5291_v17, %s5099_s6 }
 0x194   : > { %1931 = vrot.lane.b32.xlu0 %v5291_v17, %s5097_s30 }
 0x197   : > { %981 = vrot.lane.b32.xlu1 %v5335_v46, %s5094_s24 }
 0x198   : > { %1109 = vrot.lane.b32.xlu0 %v5335_v46, %s5096_s29 }
 0x199   : > { %v1026_v44 = vpop.permute.xlu1 %1025 }
 0x19a   : > { %1073 = vst.msk [vmem:[#allocation2 + $0x2] sm:$0x1] %vm880_vm1, %v1026_v44  ;;  %v962_v58 = vpop.permute.xlu0 %961 }
 0x19b   : > { %1009 = vst.msk [vmem:[#allocation2 + $0x1] sm:$0x1] %vm880_vm1, %v962_v58  ;;  %1045 = vrot.lane.b32.xlu1 %v5335_v46, %s5093_s22 }
 0x19c   : > { %1237 = vrot.lane.b32.xlu0 %v5335_v46, %s5098_s5 }
 0x19d   : > { %v1154_v62 = vpop.permute.xlu1 %1153 }
 0x19e   : > { %1201 = vst.msk [vmem:[#allocation2 + $0x4] sm:$0x1] %vm880_vm1, %v1154_v62  ;;  %v1090_v8 = vpop.permute.xlu0 %1089 }
 0x19f   : > { %1137 = vst.msk [vmem:[#allocation2 + $0x3] sm:$0x1] %vm880_vm1, %v1090_v8  ;;  %1173 = vrot.lane.b32.xlu1 %v5335_v46, %s5095_s26 }
 0x1a0   : > { %1365 = vrot.lane.b32.xlu0 %v5335_v46, %s5099_s6 }
 0x1a1   : > { %v1282_v15 = vpop.permute.xlu1 %1281 }
 0x1a2   : > { %1329 = vst.msk [vmem:[#allocation2 + $0x6] sm:$0x1] %vm880_vm1, %v1282_v15  ;;  %v1218_v17 = vpop.permute.xlu0 %1217 }
 0x1a3   : > { %1265 = vst.msk [vmem:[#allocation2 + $0x5] sm:$0x1] %vm880_vm1, %v1218_v17  ;;  %1301 = vrot.lane.b32.xlu1 %v5335_v46, %s5097_s30 }
 0x1a4   : > { %985 = vrot.lane.b32.xlu0 %v5338_v47, %s5094_s24 }
 0x1a5   : > { %v1606_v22 = vpop.permute.xlu1 %1605 }
 0x1a6   : > { %1653 = vst.msk [vmem:[#allocation2 + $0x9] sm:$0x1] %vm880_vm1, %v1606_v22  ;;  %v1346_v23 = vpop.permute.xlu0 %1345 }
 0x1a7   : > { %1393 = vst.msk [vmem:[#allocation2 + $0x7] sm:$0x1] %vm880_vm1, %v1346_v23  ;;  %1049 = vrot.lane.b32.xlu1 %v5338_v47, %s5093_s22 }
 0x1a8   : > { %1113 = vrot.lane.b32.xlu0 %v5338_v47, %s5096_s29 }
 0x1a9   : > { %v1734_v24 = vpop.permute.xlu1 %1733 }
 0x1aa   : > { %1781 = vst.msk [vmem:[#allocation2 + $0xb] sm:$0x1] %vm880_vm1, %v1734_v24  ;;  %v1670_v25 = vpop.permute.xlu0 %1669 }
 0x1ab   : > { %1717 = vst.msk [vmem:[#allocation2 + $0xa] sm:$0x1] %vm880_vm1, %v1670_v25  ;;  %1177 = vrot.lane.b32.xlu1 %v5338_v47, %s5095_s26 }
 0x1ac   : > { %1241 = vrot.lane.b32.xlu0 %v5338_v47, %s5098_s5 }
 0x1ad   : > { %v1862_v26 = vpop.permute.xlu1 %1861 }
 0x1ae   : > { %1909 = vst.msk [vmem:[#allocation2 + $0xd] sm:$0x1] %vm880_vm1, %v1862_v26  ;;  %v1798_v27 = vpop.permute.xlu0 %1797  ;;  %v2053_v28 = vld [vmem:[#allocation2] sm:$0xff] }
 0x1af   : > { %1845 = vst.msk [vmem:[#allocation2 + $0xc] sm:$0x1] %vm880_vm1, %v1798_v27  ;;  %1305 = vrot.lane.b32.xlu1 %v5338_v47, %s5097_s30  ;;  %v2089_v29 = vsel %vm2087_vm2, %v2053_v28, 0 }
 0x1b0   : > { %1369 = vrot.lane.b32.xlu0 %v5338_v47, %s5099_s6  ;;  %v5527_v30 = vand.u32 4294901760, %v2089_v29  ;;  %v5556_v47 = vsub.f32 %v5400_v5, %v2185_v11 }
 0x1b1   : > { %v1990_v31 = vpop.permute.xlu1 %1989 }
 0x1b2   : > { %2037 = vst.msk [vmem:[#allocation2 + $0xf] sm:$0x1] %vm880_vm1, %v1990_v31  ;;  %v1926_v32 = vpop.permute.xlu0 %1925  ;;  %v5531_v33 = vsub.f32 %v2089_v29, %v5527_v30  ;;  %v5569_v53 = vpack.c.bf16 %v5561_v48, %v5556_v47 }
 0x1b3   : > { %1973 = vst.msk [vmem:[#allocation2 + $0xe] sm:$0x1] %vm880_vm1, %v1926_v32  ;;  %1625 = vrot.lane.b32.xlu1 %v5371_v59, %s5094_s24 }
 0x1b4   : > { %1689 = vrot.lane.b32.xlu0 %v5371_v59, %s5093_s22  ;;  %v2253_v34 = vand.u32 4294901760, %v5531_v33  ;;  %4756 = vmatprep.subr.bf16.mxu1 %v5569_v53 }
 0x1b5   : > { %v1028_v35 = vpop.permute.xlu1 %1027  ;;  %4757 = vmatpush3.bf16.msra.mxu1 %v5569_v53 }
 0x1b6   : > { %1074 = vst.msk [vmem:[#allocation2 + $0x12] sm:$0x1] %vm880_vm1, %v1028_v35  ;;  %v964_v38 = vpop.permute.xlu0 %963  ;;  %v2254_v39 = vsub.f32 %v5531_v33, %v2253_v34  ;;  %4745 = vmatprep.subr.bf16.mxu1 %v5416_v13 }
 0x1b7   : > { %1010 = vst.msk [vmem:[#allocation2 + $0x11] sm:$0x1] %vm880_vm1, %v964_v38  ;;  %1753 = vrot.lane.b32.xlu1 %v5371_v59, %s5096_s29 }
 0x1b8   : > { %1817 = vrot.lane.b32.xlu0 %v5371_v59, %s5095_s26  ;;  %v2255_v40 = vand.u32 4294901760, %v2254_v39 }
 0x1b9   : > { %v1156_v41 = vpop.permute.xlu1 %1155 }
 0x1ba   : > { %4424 = vmatprep.mubr.f32.mxu0 %v2255_v40  ;;  %1202 = vst.msk [vmem:[#allocation2 + $0x14] sm:$0x1] %vm880_vm1, %v1156_v41  ;;  %v1092_v42 = vpop.permute.xlu0 %1091  ;;  %v2054_v43 = vld [vmem:[#allocation2 + $0x8] sm:$0xff] }
 0x1bb   : > { %1138 = vst.msk [vmem:[#allocation2 + $0x13] sm:$0x1] %vm880_vm1, %v1092_v42  ;;  %1881 = vrot.lane.b32.xlu1 %v5371_v59, %s5098_s5  ;;  %v2092_v46 = vsel %vm2087_vm2, %v2054_v43, 0 }
 0x1bc   : > { %1945 = vrot.lane.b32.xlu0 %v5371_v59, %s5097_s30  ;;  %v5565_v49 = vand.u32 4294901760, %v2092_v46 }
 0x1bd   : > { %v1284_v50 = vpop.permute.xlu1 %1283 }
 0x1be   : > { %1330 = vst.msk [vmem:[#allocation2 + $0x16] sm:$0x1] %vm880_vm1, %v1284_v50  ;;  %v1220_v54 = vpop.permute.xlu0 %1219  ;;  %v5573_v55 = vsub.f32 %v2092_v46, %v5565_v49 }
 0x1bf   : > { %1266 = vst.msk [vmem:[#allocation2 + $0x15] sm:$0x1] %vm880_vm1, %v1220_v54  ;;  %2009 = vrot.lane.b32.xlu1 %v5371_v59, %s5099_s6 }
 0x1c0   : > { %1693 = vrot.lane.b32.xlu0 %v5374_v63, %s5093_s22  ;;  %v2263_v5 = vand.u32 4294901760, %v5573_v55 }
 0x1c1   : > { %v1030_v6 = vpop.permute.xlu1 %1029 }
 0x1c2   : > { %1075 = vst.msk [vmem:[#allocation2 + $0x22] sm:$0x1] %vm880_vm1, %v1030_v6  ;;  %v1348_v7 = vpop.permute.xlu0 %1347  ;;  %v2264_v11 = vsub.f32 %v5573_v55, %v2263_v5 }
 0x1c3   : > { %1394 = vst.msk [vmem:[#allocation2 + $0x17] sm:$0x1] %vm880_vm1, %v1348_v7  ;;  %1629 = vrot.lane.b32.xlu1 %v5374_v63, %s5094_s24 }
 0x1c4   : > { %1821 = vrot.lane.b32.xlu0 %v5374_v63, %s5095_s26  ;;  %v2265_v59 = vand.u32 4294901760, %v2264_v11 }
 0x1c5   : > { %v1158_v12 = vpop.permute.xlu1 %1157 }
 0x1c6   : > { %4425 = vmatmul.mubr.f32.vlgmr.msra.gmra.mrb[4].mxu0 %v2265_v59  ;;  %1203 = vst.msk [vmem:[#allocation2 + $0x24] sm:$0x1] %vm880_vm1, %v1158_v12  ;;  %v966_v57 = vpop.permute.xlu0 %965 }
 0x1c7   : > { %1011 = vst.msk [vmem:[#allocation2 + $0x21] sm:$0x1] %vm880_vm1, %v966_v57  ;;  %1757 = vrot.lane.b32.xlu1 %v5374_v63, %s5096_s29 }
 0x1c8   : > { %1949 = vrot.lane.b32.xlu0 %v5374_v63, %s5097_s30 }
 0x1c9   : > { %v1286_v21 = vpop.permute.xlu1 %1285 }
 0x1ca   : > { %1331 = vst.msk [vmem:[#allocation2 + $0x26] sm:$0x1] %vm880_vm1, %v1286_v21  ;;  %v1094_v44 = vpop.permute.xlu0 %1093  ;;  %v2055_v58 = vld [vmem:[#allocation2 + $0x10] sm:$0xff] }
 0x1cb   : > { %1139 = vst.msk [vmem:[#allocation2 + $0x23] sm:$0x1] %vm880_vm1, %v1094_v44  ;;  %1885 = vrot.lane.b32.xlu1 %v5374_v63, %s5098_s5  ;;  %v2095_v62 = vsel %vm2087_vm2, %v2055_v58, 0 }
 0x1cc   : > { %983 = vrot.lane.b32.xlu0 %v5348_v51, %s5094_s24  ;;  %v5606_v8 = vand.u32 4294901760, %v2095_v62 }
 0x1cd   : > { %v1608_v15 = vpop.permute.xlu1 %1607 }
 0x1ce   : > { %1654 = vst.msk [vmem:[#allocation2 + $0x19] sm:$0x1] %vm880_vm1, %v1608_v15  ;;  %v1222_v17 = vpop.permute.xlu0 %1221  ;;  %v5610_v22 = vsub.f32 %v2095_v62, %v5606_v8 }
 0x1cf   : > { %1267 = vst.msk [vmem:[#allocation2 + $0x25] sm:$0x1] %vm880_vm1, %v1222_v17  ;;  %2013 = vrot.lane.b32.xlu1 %v5374_v63, %s5099_s6 }
 0x1d0   : > { %1111 = vrot.lane.b32.xlu0 %v5348_v51, %s5096_s29  ;;  %v2273_v23 = vand.u32 4294901760, %v5610_v22 }
 0x1d1   : > { %v1736_v24 = vpop.permute.xlu1 %1735 }
 0x1d2   : > { %1782 = vst.msk [vmem:[#allocation2 + $0x1b] sm:$0x1] %vm880_vm1, %v1736_v24  ;;  %v1350_v25 = vpop.permute.xlu0 %1349  ;;  %v2274_v26 = vsub.f32 %v5610_v22, %v2273_v23 }
 0x1d3   : > { %1395 = vst.msk [vmem:[#allocation2 + $0x27] sm:$0x1] %vm880_vm1, %v1350_v25  ;;  %1047 = vrot.lane.b32.xlu1 %v5348_v51, %s5093_s22 }
 0x1d4   : > { %1239 = vrot.lane.b32.xlu0 %v5348_v51, %s5098_s5  ;;  %v2275_v63 = vand.u32 4294901760, %v2274_v26 }
 0x1d5   : > { %v1864_v27 = vpop.permute.xlu1 %1863 }
 0x1d6   : > { %1910 = vst.msk [vmem:[#allocation2 + $0x1d] sm:$0x1] %vm880_vm1, %v1864_v27  ;;  %v1672_v28 = vpop.permute.xlu0 %1671  ;;  %4427 = vmatprep.mubr.f32.mxu0 %v2275_v63 }
 0x1d7   : > { %1718 = vst.msk [vmem:[#allocation2 + $0x1a] sm:$0x1] %vm880_vm1, %v1672_v28  ;;  %1175 = vrot.lane.b32.xlu1 %v5348_v51, %s5095_s26 }
 0x1d8   : > { %1367 = vrot.lane.b32.xlu0 %v5348_v51, %s5099_s6 }
 0x1d9   : > { %v1992_v29 = vpop.permute.xlu1 %1991 }
 0x1da   : > { %2038 = vst.msk [vmem:[#allocation2 + $0x1f] sm:$0x1] %vm880_vm1, %v1992_v29  ;;  %v1800_v31 = vpop.permute.xlu0 %1799  ;;  %v2057_v32 = vld [vmem:[#allocation2 + $0x20] sm:$0xff] }
 0x1db   : > { %1846 = vst.msk [vmem:[#allocation2 + $0x1c] sm:$0x1] %vm880_vm1, %v1800_v31  ;;  %1303 = vrot.lane.b32.xlu1 %v5348_v51, %s5097_s30  ;;  %v2101_v39 = vsel %vm2087_vm2, %v2057_v32, 0 }
 0x1dc   : > { %987 = vrot.lane.b32.xlu0 %v5351_v52, %s5094_s24  ;;  %v5646_v51 = vand.u32 4294901760, %v2101_v39 }
 0x1dd   : > { %v1610_v35 = vpop.permute.xlu1 %1609 }
 0x1de   : > { %1655 = vst.msk [vmem:[#allocation2 + $0x29] sm:$0x1] %vm880_vm1, %v1610_v35  ;;  %v1928_v38 = vpop.permute.xlu0 %1927  ;;  %v5655_v43 = vsub.f32 %v2101_v39, %v5646_v51 }
 0x1df   : > { %1974 = vst.msk [vmem:[#allocation2 + $0x1e] sm:$0x1] %vm880_vm1, %v1928_v38  ;;  %1051 = vrot.lane.b32.xlu1 %v5351_v52, %s5093_s22 }
 0x1e0   : > { %1115 = vrot.lane.b32.xlu0 %v5351_v52, %s5096_s29  ;;  %6700 = vst [vmem:[#allocation6_spill] sm:$0xff] %v5655_v43  ;;  %v2293_v11 = vand.u32 4294901760, %v5655_v43 }
 0x1e1   : > { %v1738_v40 = vpop.permute.xlu1 %1737 }
 0x1e2   : > { %1783 = vst.msk [vmem:[#allocation2 + $0x2b] sm:$0x1] %vm880_vm1, %v1738_v40  ;;  %v1674_v41 = vpop.permute.xlu0 %1673  ;;  %v2294_v21 = vsub.f32 %v5655_v43, %v2293_v11 }
 0x1e3   : > { %1719 = vst.msk [vmem:[#allocation2 + $0x2a] sm:$0x1] %vm880_vm1, %v1674_v41  ;;  %1179 = vrot.lane.b32.xlu1 %v5351_v52, %s5095_s26 }
 0x1e4   : > { %1243 = vrot.lane.b32.xlu0 %v5351_v52, %s5098_s5  ;;  %v2295_v17 = vand.u32 4294901760, %v2294_v21 }
 0x1e5   : > { %v1866_v42 = vpop.permute.xlu1 %1865 }
 0x1e6   : > { %1911 = vst.msk [vmem:[#allocation2 + $0x2d] sm:$0x1] %vm880_vm1, %v1866_v42  ;;  %v1802_v46 = vpop.permute.xlu0 %1801  ;;  %v2056_v50 = vld [vmem:[#allocation2 + $0x18] sm:$0xff] }
 0x1e7   : > { %1847 = vst.msk [vmem:[#allocation2 + $0x2c] sm:$0x1] %vm880_vm1, %v1802_v46  ;;  %1307 = vrot.lane.b32.xlu1 %v5351_v52, %s5097_s30  ;;  %v2098_v54 = vsel %vm2087_vm2, %v2056_v50, 0 }
 0x1e8   : > { %1371 = vrot.lane.b32.xlu0 %v5351_v52, %s5099_s6  ;;  %v5664_v6 = vand.u32 4294901760, %v2098_v54 }
 0x1e9   : > { %v1994_v7 = vpop.permute.xlu1 %1993 }
 0x1ea   : > { %2039 = vst.msk [vmem:[#allocation2 + $0x2f] sm:$0x1] %vm880_vm1, %v1994_v7  ;;  %v1930_v59 = vpop.permute.xlu0 %1929  ;;  %v5669_v12 = vsub.f32 %v2098_v54, %v5664_v6 }
 0x1eb   : > { %1975 = vst.msk [vmem:[#allocation2 + $0x2e] sm:$0x1] %vm880_vm1, %v1930_v59  ;;  %1053 = vrot.lane.b32.xlu1 %v5354_v36, %s5093_s22 }
 0x1ec   : > { %989 = vrot.lane.b32.xlu0 %v5354_v36, %s5094_s24  ;;  %v2283_v52 = vand.u32 4294901760, %v5669_v12 }
 0x1ed   : > { %v1032_v57 = vpop.permute.xlu1 %1031 }
 0x1ee   : > { %1076 = vst.msk [vmem:[#allocation2 + $0x32] sm:$0x1] %vm880_vm1, %v1032_v57  ;;  %v968_v44 = vpop.permute.xlu0 %967  ;;  %v2284_v58 = vsub.f32 %v5669_v12, %v2283_v52 }
 0x1ef   : > { %1012 = vst.msk [vmem:[#allocation2 + $0x31] sm:$0x1] %vm880_vm1, %v968_v44  ;;  %1181 = vrot.lane.b32.xlu1 %v5354_v36, %s5095_s26 }
 0x1f0   : > { %1117 = vrot.lane.b32.xlu0 %v5354_v36, %s5096_s29  ;;  %v2285_v62 = vand.u32 4294901760, %v2284_v58 }
 0x1f1   : > { %v1160_v15 = vpop.permute.xlu1 %1159 }
 0x1f2   : > { %4428 = vmatmul.mubr.f32.gmra.mrb[6].mxu0 %v2285_v62  ;;  %1204 = vst.msk [vmem:[#allocation2 + $0x34] sm:$0x1] %vm880_vm1, %v1160_v15  ;;  %v1096_v24 = vpop.permute.xlu0 %1095  ;;  %v2058_v25 = vld [vmem:[#allocation2 + $0x28] sm:$0xff] }
 0x1f3   : > { %1140 = vst.msk [vmem:[#allocation2 + $0x33] sm:$0x1] %vm880_vm1, %v1096_v24  ;;  %4430 = vmatprep.mubr.f32.mxu0 %v2295_v17  ;;  %1309 = vrot.lane.b32.xlu1 %v5354_v36, %s5097_s30  ;;  %v2104_v26 = vsel %vm2087_vm2, %v2058_v25, 0 }
 0x1f4   : > { %1245 = vrot.lane.b32.xlu0 %v5354_v36, %s5098_s5  ;;  %v5696_v63 = vand.u32 4294901760, %v2104_v26 }
 0x1f5   : > { %v1288_v27 = vpop.permute.xlu1 %1287 }
 0x1f6   : > { %1332 = vst.msk [vmem:[#allocation2 + $0x36] sm:$0x1] %vm880_vm1, %v1288_v27  ;;  %v1224_v28 = vpop.permute.xlu0 %1223  ;;  %v5700_v29 = vsub.f32 %v2104_v26, %v5696_v63 }
 0x1f7   : > { %1268 = vst.msk [vmem:[#allocation2 + $0x35] sm:$0x1] %vm880_vm1, %v1224_v28  ;;  %1627 = vrot.lane.b32.xlu1 %v5380_v0, %s5094_s24 }
 0x1f8   : > { %6701 = vst [vmem:[#allocation7_spill] sm:$0xff] %v5700_v29  ;;  %1373 = vrot.lane.b32.xlu0 %v5354_v36, %s5099_s6  ;;  %v2303_v31 = vand.u32 4294901760, %v5700_v29 }
 0x1f9   : > { %v1612_v32 = vpop.permute.xlu1 %1611 }
 0x1fa   : > { %1656 = vst.msk [vmem:[#allocation2 + $0x39] sm:$0x1] %vm880_vm1, %v1612_v32  ;;  %v1352_v35 = vpop.permute.xlu0 %1351  ;;  %v2304_v38 = vsub.f32 %v5700_v29, %v2303_v31 }
 0x1fb   : > { %1396 = vst.msk [vmem:[#allocation2 + $0x37] sm:$0x1] %vm880_vm1, %v1352_v35  ;;  %1755 = vrot.lane.b32.xlu1 %v5380_v0, %s5096_s29 }
 0x1fc   : > { %1691 = vrot.lane.b32.xlu0 %v5380_v0, %s5093_s22  ;;  %v2305_v39 = vand.u32 4294901760, %v2304_v38 }
 0x1fd   : > { %v1740_v36 = vpop.permute.xlu1 %1739 }
 0x1fe   : > { %4431 = vmatmul.mubr.f32.gmra.mrb[8].mxu0 %v2305_v39  ;;  %1784 = vst.msk [vmem:[#allocation2 + $0x3b] sm:$0x1] %vm880_vm1, %v1740_v36  ;;  %v1676_v40 = vpop.permute.xlu0 %1675 }
 0x1ff   : > { %1720 = vst.msk [vmem:[#allocation2 + $0x3a] sm:$0x1] %vm880_vm1, %v1676_v40  ;;  %1883 = vrot.lane.b32.xlu1 %v5380_v0, %s5098_s5 }
 0x200   : > { %1819 = vrot.lane.b32.xlu0 %v5380_v0, %s5095_s26 }
 0x201   : > { %v1868_v41 = vpop.permute.xlu1 %1867 }
 0x202   : > { %1912 = vst.msk [vmem:[#allocation2 + $0x3d] sm:$0x1] %vm880_vm1, %v1868_v41  ;;  %v1804_v42 = vpop.permute.xlu0 %1803  ;;  %v2059_v46 = vld [vmem:[#allocation2 + $0x30] sm:$0xff] }
 0x203   : > { %1848 = vst.msk [vmem:[#allocation2 + $0x3c] sm:$0x1] %vm880_vm1, %v1804_v42  ;;  %2011 = vrot.lane.b32.xlu1 %v5380_v0, %s5099_s6  ;;  %v2107_v50 = vsel %vm2087_vm2, %v2059_v46, 0 }
 0x204   : > { %1947 = vrot.lane.b32.xlu0 %v5380_v0, %s5097_s30  ;;  %v5730_v54 = vand.u32 4294901760, %v2107_v50 }
 0x205   : > { %v1996_v7 = vpop.permute.xlu1 %1995 }
 0x206   : > { %2040 = vst.msk [vmem:[#allocation2 + $0x3f] sm:$0x1] %vm880_vm1, %v1996_v7  ;;  %v1932_v59 = vpop.permute.xlu0 %1931  ;;  %v5734_v57 = vsub.f32 %v2107_v50, %v5730_v54 }
 0x207   : > { %1976 = vst.msk [vmem:[#allocation2 + $0x3e] sm:$0x1] %vm880_vm1, %v1932_v59  ;;  %1631 = vrot.lane.b32.xlu1 %v5383_v1, %s5094_s24 }
 0x208   : > { %6702 = vst [vmem:[#allocation8_spill] sm:$0xff] %v5734_v57  ;;  %1695 = vrot.lane.b32.xlu0 %v5383_v1, %s5093_s22  ;;  %v2313_v21 = vand.u32 4294901760, %v5734_v57 }
 0x209   : > { %v982_v0 = vpop.permute.xlu1 %981 }
 0x20a   : > { %1019 = vst.msk [vmem:[#allocation2 + $0xa1] sm:$0x1] %vm880_vm1, %v982_v0  ;;  %v1110_v44 = vpop.permute.xlu0 %1109  ;;  %v2314_v58 = vsub.f32 %v5734_v57, %v2313_v21 }
 0x20b   : > { %1147 = vst.msk [vmem:[#allocation2 + $0xa3] sm:$0x1] %vm880_vm1, %v1110_v44  ;;  %1759 = vrot.lane.b32.xlu1 %v5383_v1, %s5096_s29 }
 0x20c   : > { %1823 = vrot.lane.b32.xlu0 %v5383_v1, %s5095_s26  ;;  %v2315_v62 = vand.u32 4294901760, %v2314_v58 }
 0x20d   : > { %v1046_v15 = vpop.permute.xlu1 %1045 }
 0x20e   : > { %1083 = vst.msk [vmem:[#allocation2 + $0xa2] sm:$0x1] %vm880_vm1, %v1046_v15  ;;  %v1238_v17 = vpop.permute.xlu0 %1237  ;;  %4433 = vmatprep.mubr.f32.mxu0 %v2315_v62  ;;  %v2060_v24 = vld [vmem:[#allocation2 + $0x38] sm:$0xff] }
 0x20f   : > { %1275 = vst.msk [vmem:[#allocation2 + $0xa5] sm:$0x1] %vm880_vm1, %v1238_v17  ;;  %1887 = vrot.lane.b32.xlu1 %v5383_v1, %s5098_s5  ;;  %v2110_v25 = vsel %vm2087_vm2, %v2060_v24, 0 }
 0x210   : > { %1951 = vrot.lane.b32.xlu0 %v5383_v1, %s5097_s30  ;;  %v5758_v26 = vand.u32 4294901760, %v2110_v25 }
 0x211   : > { %v1174_v27 = vpop.permute.xlu1 %1173 }
 0x212   : > { %1211 = vst.msk [vmem:[#allocation2 + $0xa4] sm:$0x1] %vm880_vm1, %v1174_v27  ;;  %v1366_v28 = vpop.permute.xlu0 %1365  ;;  %v5762_v32 = vsub.f32 %v2110_v25, %v5758_v26 }
 0x213   : > { %1403 = vst.msk [vmem:[#allocation2 + $0xa7] sm:$0x1] %vm880_vm1, %v1366_v28  ;;  %2015 = vrot.lane.b32.xlu1 %v5383_v1, %s5099_s6 }
 0x214   : > { %6703 = vst [vmem:[#allocation9_spill] sm:$0xff] %v5762_v32  ;;  %1697 = vrot.lane.b32.xlu0 %v5386_v2, %s5093_s22  ;;  %v2323_v35 = vand.u32 4294901760, %v5762_v32 }
 0x215   : > { %v1302_v38 = vpop.permute.xlu1 %1301 }
 0x216   : > { %1339 = vst.msk [vmem:[#allocation2 + $0xa6] sm:$0x1] %vm880_vm1, %v1302_v38  ;;  %v986_v39 = vpop.permute.xlu0 %985  ;;  %v2324_v36 = vsub.f32 %v5762_v32, %v2323_v35 }
 0x217   : > { %1021 = vst.msk [vmem:[#allocation2 + $0xc1] sm:$0x1] %vm880_vm1, %v986_v39  ;;  %1633 = vrot.lane.b32.xlu1 %v5386_v2, %s5094_s24 }
 0x218   : > { %1825 = vrot.lane.b32.xlu0 %v5386_v2, %s5095_s26  ;;  %v2325_v1 = vand.u32 4294901760, %v2324_v36 }
 0x219   : > { %v1050_v40 = vpop.permute.xlu1 %1049 }
 0x21a   : > { %1085 = vst.msk [vmem:[#allocation2 + $0xc2] sm:$0x1] %vm880_vm1, %v1050_v40  ;;  %v1114_v41 = vpop.permute.xlu0 %1113  ;;  %4434 = vmatmul.mubr.f32.gmra.mrb[10].mxu0 %v2325_v1 }
 0x21b   : > { %1149 = vst.msk [vmem:[#allocation2 + $0xc3] sm:$0x1] %vm880_vm1, %v1114_v41  ;;  %1761 = vrot.lane.b32.xlu1 %v5386_v2, %s5096_s29 }
 0x21c   : > { %1953 = vrot.lane.b32.xlu0 %v5386_v2, %s5097_s30 }
 0x21d   : > { %v1178_v42 = vpop.permute.xlu1 %1177  ;;  %v2073_v46 = vld [vmem:[#allocation2 + $0xa0] sm:$0xff] }
 0x21e   : > { %1213 = vst.msk [vmem:[#allocation2 + $0xc4] sm:$0x1] %vm880_vm1, %v1178_v42  ;;  %v1242_v50 = vpop.permute.xlu0 %1241  ;;  %v2149_v7 = vsel %vm2087_vm2, %v2073_v46, 0 }
 0x21f   : > { %1277 = vst.msk [vmem:[#allocation2 + $0xc5] sm:$0x1] %vm880_vm1, %v1242_v50  ;;  %1889 = vrot.lane.b32.xlu1 %v5386_v2, %s5098_s5  ;;  %v5790_v59 = vand.u32 4294901760, %v2149_v7 }
 0x220   : > { %991 = vrot.lane.b32.xlu0 %v5365_v60, %s5094_s24 }
 0x221   : > { %v1306_v0 = vpop.permute.xlu1 %1305  ;;  %v5795_v44 = vsub.f32 %v2149_v7, %v5790_v59 }
 0x222   : > { %1341 = vst.msk [vmem:[#allocation2 + $0xc6] sm:$0x1] %vm880_vm1, %v1306_v0  ;;  %v1370_v58 = vpop.permute.xlu0 %1369 }
 0x223   : > { %1405 = vst.msk [vmem:[#allocation2 + $0xc7] sm:$0x1] %vm880_vm1, %v1370_v58  ;;  %2017 = vrot.lane.b32.xlu1 %v5386_v2, %s5099_s6  ;;  %4558 = vmatprep.mubr.f32.mxu1 %v5795_v44 }
 0x224   : > { %1119 = vrot.lane.b32.xlu0 %v5365_v60, %s5096_s29 }
 0x225   : > { %v1626_v62 = vpop.permute.xlu1 %1625 }
 0x226   : > { %1663 = vst.msk [vmem:[#allocation2 + $0xa9] sm:$0x1] %vm880_vm1, %v1626_v62  ;;  %v1690_v15 = vpop.permute.xlu0 %1689 }
 0x227   : > { %1727 = vst.msk [vmem:[#allocation2 + $0xaa] sm:$0x1] %vm880_vm1, %v1690_v15  ;;  %1055 = vrot.lane.b32.xlu1 %v5365_v60, %s5093_s22 }
 0x228   : > { %1247 = vrot.lane.b32.xlu0 %v5365_v60, %s5098_s5 }
 0x229   : > { %v1754_v17 = vpop.permute.xlu1 %1753 }
 0x22a   : > { %1791 = vst.msk [vmem:[#allocation2 + $0xab] sm:$0x1] %vm880_vm1, %v1754_v17  ;;  %v1818_v2 = vpop.permute.xlu0 %1817 }
 0x22b   : > { %1855 = vst.msk [vmem:[#allocation2 + $0xac] sm:$0x1] %vm880_vm1, %v1818_v2  ;;  %1183 = vrot.lane.b32.xlu1 %v5365_v60, %s5095_s26 }
 0x22c   : > { %1375 = vrot.lane.b32.xlu0 %v5365_v60, %s5099_s6 }
 0x22d   : > { %v1882_v24 = vpop.permute.xlu1 %1881 }
 0x22e   : > { %1919 = vst.msk [vmem:[#allocation2 + $0xad] sm:$0x1] %vm880_vm1, %v1882_v24  ;;  %v1946_v25 = vpop.permute.xlu0 %1945 }
 0x22f   : > { %1983 = vst.msk [vmem:[#allocation2 + $0xae] sm:$0x1] %vm880_vm1, %v1946_v25  ;;  %1311 = vrot.lane.b32.xlu1 %v5365_v60, %s5097_s30 }
 0x230   : > { %1699 = vrot.lane.b32.xlu0 %v5389_v4, %s5093_s22 }
 0x231   : > { %v2010_v27 = vpop.permute.xlu1 %2009 }
 0x232   : > { %2047 = vst.msk [vmem:[#allocation2 + $0xaf] sm:$0x1] %vm880_vm1, %v2010_v27  ;;  %v1694_v28 = vpop.permute.xlu0 %1693 }
 0x233   : > { %1729 = vst.msk [vmem:[#allocation2 + $0xca] sm:$0x1] %vm880_vm1, %v1694_v28  ;;  %1635 = vrot.lane.b32.xlu1 %v5389_v4, %s5094_s24 }
 0x234   : > { %1827 = vrot.lane.b32.xlu0 %v5389_v4, %s5095_s26 }
 0x235   : > { %v1630_v38 = vpop.permute.xlu1 %1629 }
 0x236   : > { %1665 = vst.msk [vmem:[#allocation2 + $0xc9] sm:$0x1] %vm880_vm1, %v1630_v38  ;;  %v1822_v39 = vpop.permute.xlu0 %1821 }
 0x237   : > { %1857 = vst.msk [vmem:[#allocation2 + $0xcc] sm:$0x1] %vm880_vm1, %v1822_v39  ;;  %1763 = vrot.lane.b32.xlu1 %v5389_v4, %s5096_s29 }
 0x238   : > { %1955 = vrot.lane.b32.xlu0 %v5389_v4, %s5097_s30 }
 0x239   : > { %v1758_v60 = vpop.permute.xlu1 %1757  ;;  %v2074_v36 = vld [vmem:[#allocation2 + $0xa8] sm:$0xff] }
 0x23a   : > { %1793 = vst.msk [vmem:[#allocation2 + $0xcb] sm:$0x1] %vm880_vm1, %v1758_v60  ;;  %v1950_v1 = vpop.permute.xlu0 %1949  ;;  %v2152_v40 = vsel %vm2087_vm2, %v2074_v36, 0 }
 0x23b   : > { %1985 = vst.msk [vmem:[#allocation2 + $0xce] sm:$0x1] %vm880_vm1, %v1950_v1  ;;  %1891 = vrot.lane.b32.xlu1 %v5389_v4, %s5098_s5  ;;  %v5839_v41 = vand.u32 4294901760, %v2152_v40 }
 0x23c   : > { %969 = vrot.lane.b32.xlu0 %v5249_v3, %s5094_s24 }
 0x23d   : > { %v1886_v42 = vpop.permute.xlu1 %1885  ;;  %v5844_v46 = vsub.f32 %v2152_v40, %v5839_v41 }
 0x23e   : > { %1921 = vst.msk [vmem:[#allocation2 + $0xcd] sm:$0x1] %vm880_vm1, %v1886_v42  ;;  %v984_v50 = vpop.permute.xlu0 %983 }
 0x23f   : > { %1020 = vst.msk [vmem:[#allocation2 + $0xb1] sm:$0x1] %vm880_vm1, %v984_v50  ;;  %2019 = vrot.lane.b32.xlu1 %v5389_v4, %s5099_s6  ;;  %4559 = vmatmul.mubr.f32.vlgmr.msra.gmra.mrb[0].mxu1 %v5844_v46  ;;  %v2463_v32 = vand.u32 4294901760, %v5844_v46 }
 0x240   : > { %1097 = vrot.lane.b32.xlu0 %v5249_v3, %s5096_s29  ;;  %4747 = vmatpush3.bf16.msra.mxu1 %v5416_v13 }
 0x241   : > { %v2014_v7 = vpop.permute.xlu1 %2013 }
 0x242   : > { %2049 = vst.msk [vmem:[#allocation2 + $0xcf] sm:$0x1] %vm880_vm1, %v2014_v7  ;;  %v1112_v0 = vpop.permute.xlu0 %1111 }
 0x243   : > { %1148 = vst.msk [vmem:[#allocation2 + $0xb3] sm:$0x1] %vm880_vm1, %v1112_v0  ;;  %1033 = vrot.lane.b32.xlu1 %v5249_v3, %s5093_s22 }
 0x244   : > { %1225 = vrot.lane.b32.xlu0 %v5249_v3, %s5098_s5 }
 0x245   : > { %v1048_v4 = vpop.permute.xlu1 %1047 }
 0x246   : > { %1084 = vst.msk [vmem:[#allocation2 + $0xb2] sm:$0x1] %vm880_vm1, %v1048_v4  ;;  %v1240_v58 = vpop.permute.xlu0 %1239 }
 0x247   : > { %1276 = vst.msk [vmem:[#allocation2 + $0xb5] sm:$0x1] %vm880_vm1, %v1240_v58  ;;  %1161 = vrot.lane.b32.xlu1 %v5249_v3, %s5095_s26 }
 0x248   : > { %1353 = vrot.lane.b32.xlu0 %v5249_v3, %s5099_s6 }
 0x249   : > { %v1176_v62 = vpop.permute.xlu1 %1175 }
 0x24a   : > { %1212 = vst.msk [vmem:[#allocation2 + $0xb4] sm:$0x1] %vm880_vm1, %v1176_v62  ;;  %v1368_v15 = vpop.permute.xlu0 %1367 }
 0x24b   : > { %1404 = vst.msk [vmem:[#allocation2 + $0xb7] sm:$0x1] %vm880_vm1, %v1368_v15  ;;  %1289 = vrot.lane.b32.xlu1 %v5249_v3, %s5097_s30 }
 0x24c   : > { %1677 = vrot.lane.b32.xlu0 %v5285_v16, %s5093_s22 }
 0x24d   : > { %v1304_v17 = vpop.permute.xlu1 %1303 }
 0x24e   : > { %1340 = vst.msk [vmem:[#allocation2 + $0xb6] sm:$0x1] %vm880_vm1, %v1304_v17  ;;  %v988_v2 = vpop.permute.xlu0 %987 }
 0x24f   : > { %1022 = vst.msk [vmem:[#allocation2 + $0xd1] sm:$0x1] %vm880_vm1, %v988_v2  ;;  %1613 = vrot.lane.b32.xlu1 %v5285_v16, %s5094_s24 }
 0x250   : > { %1805 = vrot.lane.b32.xlu0 %v5285_v16, %s5095_s26 }
 0x251   : > { %v1052_v24 = vpop.permute.xlu1 %1051 }
 0x252   : > { %1086 = vst.msk [vmem:[#allocation2 + $0xd2] sm:$0x1] %vm880_vm1, %v1052_v24  ;;  %v1116_v25 = vpop.permute.xlu0 %1115 }
 0x253   : > { %1150 = vst.msk [vmem:[#allocation2 + $0xd3] sm:$0x1] %vm880_vm1, %v1116_v25  ;;  %1741 = vrot.lane.b32.xlu1 %v5285_v16, %s5096_s29 }
 0x254   : > { %1933 = vrot.lane.b32.xlu0 %v5285_v16, %s5097_s30 }
 0x255   : > { %v1180_v3 = vpop.permute.xlu1 %1179  ;;  %v2075_v27 = vld [vmem:[#allocation2 + $0xb0] sm:$0xff] }
 0x256   : > { %1214 = vst.msk [vmem:[#allocation2 + $0xd4] sm:$0x1] %vm880_vm1, %v1180_v3  ;;  %v1244_v28 = vpop.permute.xlu0 %1243  ;;  %v2155_v38 = vsel %vm2087_vm2, %v2075_v27, 0  ;;  %v2077_v3 = vld [vmem:[#allocation2 + $0xc0] sm:$0xff] }
 0x257   : > { %1278 = vst.msk [vmem:[#allocation2 + $0xd5] sm:$0x1] %vm880_vm1, %v1244_v28  ;;  %1869 = vrot.lane.b32.xlu1 %v5285_v16, %s5098_s5  ;;  %v5889_v39 = vand.u32 4294901760, %v2155_v38  ;;  %v2161_v28 = vsel %vm2087_vm2, %v2077_v3, 0 }
 0x258   : > { %971 = vrot.lane.b32.xlu0 %v5266_v9, %s5094_s24 }
 0x259   : > { %v1308_v60 = vpop.permute.xlu1 %1307  ;;  %v5894_v36 = vsub.f32 %v2155_v38, %v5889_v39  ;;  %v2078_v38 = vld [vmem:[#allocation2 + $0xc8] sm:$0xff] }
 0x25a   : > { %1342 = vst.msk [vmem:[#allocation2 + $0xd6] sm:$0x1] %vm880_vm1, %v1308_v60  ;;  %v1372_v1 = vpop.permute.xlu0 %1371 }
 0x25b   : > { %1406 = vst.msk [vmem:[#allocation2 + $0xd7] sm:$0x1] %vm880_vm1, %v1372_v1  ;;  %4561 = vmatprep.mubr.f32.mxu1 %v5894_v36  ;;  %1997 = vrot.lane.b32.xlu1 %v5285_v16, %s5099_s6 }
 0x25c   : > { %1099 = vrot.lane.b32.xlu0 %v5266_v9, %s5096_s29 }
 0x25d   : > { %v1054_v40 = vpop.permute.xlu1 %1053 }
 0x25e   : > { %1087 = vst.msk [vmem:[#allocation2 + $0xe2] sm:$0x1] %vm880_vm1, %v1054_v40  ;;  %v990_v42 = vpop.permute.xlu0 %989 }
 0x25f   : > { %1023 = vst.msk [vmem:[#allocation2 + $0xe1] sm:$0x1] %vm880_vm1, %v990_v42  ;;  %1035 = vrot.lane.b32.xlu1 %v5266_v9, %s5093_s22 }
 0x260   : > { %1227 = vrot.lane.b32.xlu0 %v5266_v9, %s5098_s5 }
 0x261   : > { %v1182_v50 = vpop.permute.xlu1 %1181 }
 0x262   : > { %1215 = vst.msk [vmem:[#allocation2 + $0xe4] sm:$0x1] %vm880_vm1, %v1182_v50  ;;  %v1118_v7 = vpop.permute.xlu0 %1117  ;;  %v2079_v60 = vld [vmem:[#allocation2 + $0xd0] sm:$0xff]  ;;  %v5957_v50 = vand.u32 4294901760, %v2161_v28 }
 0x263   : > { %1151 = vst.msk [vmem:[#allocation2 + $0xe3] sm:$0x1] %vm880_vm1, %v1118_v7  ;;  %1163 = vrot.lane.b32.xlu1 %v5266_v9, %s5095_s26  ;;  %v2164_v7 = vsel %vm2087_vm2, %v2078_v38, 0 }
 0x264   : > { %1355 = vrot.lane.b32.xlu0 %v5266_v9, %s5099_s6 }
 0x265   : > { %v1310_v16 = vpop.permute.xlu1 %1309 }
 0x266   : > { %1343 = vst.msk [vmem:[#allocation2 + $0xe6] sm:$0x1] %vm880_vm1, %v1310_v16  ;;  %v1246_v0 = vpop.permute.xlu0 %1245 }
 0x267   : > { %1279 = vst.msk [vmem:[#allocation2 + $0xe5] sm:$0x1] %vm880_vm1, %v1246_v0  ;;  %1291 = vrot.lane.b32.xlu1 %v5266_v9, %s5097_s30  ;;  %v2167_v0 = vsel %vm2087_vm2, %v2079_v60, 0 }
 0x268   : > { %1679 = vrot.lane.b32.xlu0 %v5294_v18, %s5093_s22 }
 0x269   : > { %v1628_v4 = vpop.permute.xlu1 %1627 }
 0x26a   : > { %1664 = vst.msk [vmem:[#allocation2 + $0xb9] sm:$0x1] %vm880_vm1, %v1628_v4  ;;  %v1374_v58 = vpop.permute.xlu0 %1373 }
 0x26b   : > { %1407 = vst.msk [vmem:[#allocation2 + $0xe7] sm:$0x1] %vm880_vm1, %v1374_v58  ;;  %1615 = vrot.lane.b32.xlu1 %v5294_v18, %s5094_s24 }
 0x26c   : > { %1807 = vrot.lane.b32.xlu0 %v5294_v18, %s5095_s26 }
 0x26d   : > { %v1756_v62 = vpop.permute.xlu1 %1755 }
 0x26e   : > { %1792 = vst.msk [vmem:[#allocation2 + $0xbb] sm:$0x1] %vm880_vm1, %v1756_v62  ;;  %v1692_v15 = vpop.permute.xlu0 %1691 }
 0x26f   : > { %1728 = vst.msk [vmem:[#allocation2 + $0xba] sm:$0x1] %vm880_vm1, %v1692_v15  ;;  %1743 = vrot.lane.b32.xlu1 %v5294_v18, %s5096_s29  ;;  %v5969_v15 = vand.u32 4294901760, %v2164_v7 }
 0x270   : > { %1935 = vrot.lane.b32.xlu0 %v5294_v18, %s5097_s30 }
 0x271   : > { %v1884_v9 = vpop.permute.xlu1 %1883 }
 0x272   : > { %1920 = vst.msk [vmem:[#allocation2 + $0xbd] sm:$0x1] %vm880_vm1, %v1884_v9  ;;  %v1820_v17 = vpop.permute.xlu0 %1819  ;;  %v5975_v9 = vsub.f32 %v2161_v28, %v5957_v50  ;;  %v2081_v3 = vld [vmem:[#allocation2 + $0xe0] sm:$0xff] }
 0x273   : > { %1856 = vst.msk [vmem:[#allocation2 + $0xbc] sm:$0x1] %vm880_vm1, %v1820_v17  ;;  %1871 = vrot.lane.b32.xlu1 %v5294_v18, %s5098_s5  ;;  %v5977_v17 = vand.u32 4294901760, %v2167_v0  ;;  %v2173_v38 = vsel %vm2087_vm2, %v2081_v3, 0 }
 0x274   : > { %973 = vrot.lane.b32.xlu0 %v5269_v10, %s5094_s24  ;;  %v2493_v29 = vand.u32 4294901760, %v5975_v9 }
 0x275   : > { %v2012_v2 = vpop.permute.xlu1 %2011 }
 0x276   : > { %2048 = vst.msk [vmem:[#allocation2 + $0xbf] sm:$0x1] %vm880_vm1, %v2012_v2  ;;  %v1948_v24 = vpop.permute.xlu0 %1947 }
 0x277   : > { %1984 = vst.msk [vmem:[#allocation2 + $0xbe] sm:$0x1] %vm880_vm1, %v1948_v24  ;;  %1999 = vrot.lane.b32.xlu1 %v5294_v18, %s5099_s6 }
 0x278   : > { %1101 = vrot.lane.b32.xlu0 %v5269_v10, %s5096_s29 }
 0x279   : > { %v1632_v25 = vpop.permute.xlu1 %1631 }
 0x27a   : > { %1666 = vst.msk [vmem:[#allocation2 + $0xd9] sm:$0x1] %vm880_vm1, %v1632_v25  ;;  %v1696_v27 = vpop.permute.xlu0 %1695  ;;  %v5985_v25 = vsub.f32 %v2164_v7, %v5969_v15 }
 0x27b   : > { %1730 = vst.msk [vmem:[#allocation2 + $0xda] sm:$0x1] %vm880_vm1, %v1696_v27  ;;  %1037 = vrot.lane.b32.xlu1 %v5269_v10, %s5093_s22 }
 0x27c   : > { %1229 = vrot.lane.b32.xlu0 %v5269_v10, %s5098_s5 }
 0x27d   : > { %v1760_v18 = vpop.permute.xlu1 %1759 }
 0x27e   : > { %1794 = vst.msk [vmem:[#allocation2 + $0xdb] sm:$0x1] %vm880_vm1, %v1760_v18  ;;  %v1824_v1 = vpop.permute.xlu0 %1823  ;;  %v2076_v40 = vld [vmem:[#allocation2 + $0xb8] sm:$0xff] }
 0x27f   : > { %1858 = vst.msk [vmem:[#allocation2 + $0xdc] sm:$0x1] %vm880_vm1, %v1824_v1  ;;  %1165 = vrot.lane.b32.xlu1 %v5269_v10, %s5095_s26  ;;  %v2158_v42 = vsel %vm2087_vm2, %v2076_v40, 0 }
 0x280   : > { %1357 = vrot.lane.b32.xlu0 %v5269_v10, %s5099_s6  ;;  %v5962_v16 = vand.u32 4294901760, %v2158_v42 }
 0x281   : > { %v1888_v4 = vpop.permute.xlu1 %1887 }
 0x282   : > { %1922 = vst.msk [vmem:[#allocation2 + $0xdd] sm:$0x1] %vm880_vm1, %v1888_v4  ;;  %v1952_v58 = vpop.permute.xlu0 %1951  ;;  %v5967_v62 = vsub.f32 %v2158_v42, %v5962_v16  ;;  %v6006_v42 = vand.u32 4294901760, %v2173_v38 }
 0x283   : > { %1986 = vst.msk [vmem:[#allocation2 + $0xde] sm:$0x1] %vm880_vm1, %v1952_v58  ;;  %1293 = vrot.lane.b32.xlu1 %v5269_v10, %s5097_s30  ;;  %v5991_v10 = vsub.f32 %v2167_v0, %v5977_v17 }
 0x284   : > { %4562 = vmatmul.mubr.f32.gmra.mrb[2].mxu1 %v5967_v62  ;;  %1681 = vrot.lane.b32.xlu0 %v5297_v19, %s5093_s22 }
 0x285   : > { %4564 = vmatprep.mubr.f32.mxu1 %v5975_v9  ;;  %v2016_v2 = vpop.permute.xlu1 %2015 }
 0x286   : > { %2050 = vst.msk [vmem:[#allocation2 + $0xdf] sm:$0x1] %vm880_vm1, %v2016_v2  ;;  %v1698_v24 = vpop.permute.xlu0 %1697  ;;  %v6020_v2 = vsub.f32 %v2173_v38, %v6006_v42 }
 0x287   : > { %1731 = vst.msk [vmem:[#allocation2 + $0xea] sm:$0x1] %vm880_vm1, %v1698_v24  ;;  %1617 = vrot.lane.b32.xlu1 %v5297_v19, %s5094_s24 }
 0x288   : > { %4565 = vmatmul.mubr.f32.gmra.mrb[4].mxu1 %v5985_v25  ;;  %1809 = vrot.lane.b32.xlu0 %v5297_v19, %s5095_s26 }
 0x289   : > { %4567 = vmatprep.mubr.f32.mxu1 %v5991_v10  ;;  %v1634_v27 = vpop.permute.xlu1 %1633 }
 0x28a   : > { %1667 = vst.msk [vmem:[#allocation2 + $0xe9] sm:$0x1] %vm880_vm1, %v1634_v27  ;;  %v1826_v28 = vpop.permute.xlu0 %1825 }
 0x28b   : > { %1859 = vst.msk [vmem:[#allocation2 + $0xec] sm:$0x1] %vm880_vm1, %v1826_v28  ;;  %1745 = vrot.lane.b32.xlu1 %v5297_v19, %s5096_s29 }
 0x28c   : > { %1937 = vrot.lane.b32.xlu0 %v5297_v19, %s5097_s30 }
 0x28d   : > { %v1762_v18 = vpop.permute.xlu1 %1761  ;;  %v2080_v60 = vld [vmem:[#allocation2 + $0xd8] sm:$0xff] }
 0x28e   : > { %1795 = vst.msk [vmem:[#allocation2 + $0xeb] sm:$0x1] %vm880_vm1, %v1762_v18  ;;  %v1954_v1 = vpop.permute.xlu0 %1953  ;;  %v2170_v40 = vsel %vm2087_vm2, %v2080_v60, 0 }
 0x28f   : > { %1987 = vst.msk [vmem:[#allocation2 + $0xee] sm:$0x1] %vm880_vm1, %v1954_v1  ;;  %1873 = vrot.lane.b32.xlu1 %v5297_v19, %s5098_s5  ;;  %v6011_v7 = vand.u32 4294901760, %v2170_v40 }
 0x290   : > { %975 = vrot.lane.b32.xlu0 %v5279_v14, %s5094_s24 }
 0x291   : > { %v1890_v0 = vpop.permute.xlu1 %1889  ;;  %v6016_v4 = vsub.f32 %v2170_v40, %v6011_v7 }
 0x292   : > { %1923 = vst.msk [vmem:[#allocation2 + $0xed] sm:$0x1] %vm880_vm1, %v1890_v0  ;;  %v992_v58 = vpop.permute.xlu0 %991 }
 0x293   : > { %1024 = vst.msk [vmem:[#allocation2 + $0xf1] sm:$0x1] %vm880_vm1, %v992_v58  ;;  %4568 = vmatmul.mubr.f32.gmra.mrb[6].mxu1 %v6016_v4  ;;  %2001 = vrot.lane.b32.xlu1 %v5297_v19, %s5099_s6 }
 0x294   : > { %1103 = vrot.lane.b32.xlu0 %v5279_v14, %s5096_s29  ;;  %4570 = vmatprep.mubr.f32.mxu1 %v6020_v2 }
 0x295   : > { %v2018_v24 = vpop.permute.xlu1 %2017 }
 0x296   : > { %2051 = vst.msk [vmem:[#allocation2 + $0xef] sm:$0x1] %vm880_vm1, %v2018_v24  ;;  %v1120_v3 = vpop.permute.xlu0 %1119 }
 0x297   : > { %1152 = vst.msk [vmem:[#allocation2 + $0xf3] sm:$0x1] %vm880_vm1, %v1120_v3  ;;  %1039 = vrot.lane.b32.xlu1 %v5279_v14, %s5093_s22 }
 0x298   : > { %1231 = vrot.lane.b32.xlu0 %v5279_v14, %s5098_s5 }
 0x299   : > { %v1056_v27 = vpop.permute.xlu1 %1055 }
 0x29a   : > { %1088 = vst.msk [vmem:[#allocation2 + $0xf2] sm:$0x1] %vm880_vm1, %v1056_v27  ;;  %v1248_v19 = vpop.permute.xlu0 %1247 }
 0x29b   : > { %1280 = vst.msk [vmem:[#allocation2 + $0xf5] sm:$0x1] %vm880_vm1, %v1248_v19  ;;  %1167 = vrot.lane.b32.xlu1 %v5279_v14, %s5095_s26 }
 0x29c   : > { %1359 = vrot.lane.b32.xlu0 %v5279_v14, %s5099_s6 }
 0x29d   : > { %v1184_v28 = vpop.permute.xlu1 %1183  ;;  %v2082_v38 = vld [vmem:[#allocation2 + $0xe8] sm:$0xff] }
 0x29e   : > { %1216 = vst.msk [vmem:[#allocation2 + $0xf4] sm:$0x1] %vm880_vm1, %v1184_v28  ;;  %v1376_v18 = vpop.permute.xlu0 %1375  ;;  %v2176_v60 = vsel %vm2087_vm2, %v2082_v38, 0 }
 0x29f   : > { %1408 = vst.msk [vmem:[#allocation2 + $0xf7] sm:$0x1] %vm880_vm1, %v1376_v18  ;;  %1295 = vrot.lane.b32.xlu1 %v5279_v14, %s5097_s30  ;;  %v6046_v1 = vand.u32 4294901760, %v2176_v60 }
 0x2a0   : > { %1683 = vrot.lane.b32.xlu0 %v5300_v20, %s5093_s22 }
 0x2a1   : > { %v1312_v40 = vpop.permute.xlu1 %1311  ;;  %v6051_v0 = vsub.f32 %v2176_v60, %v6046_v1 }
 0x2a2   : > { %1344 = vst.msk [vmem:[#allocation2 + $0xf6] sm:$0x1] %vm880_vm1, %v1312_v40  ;;  %v1700_v58 = vpop.permute.xlu0 %1699 }
 0x2a3   : > { %1732 = vst.msk [vmem:[#allocation2 + $0xfa] sm:$0x1] %vm880_vm1, %v1700_v58  ;;  %4571 = vmatmul.mubr.f32.gmra.mrb[8].mxu1 %v6051_v0  ;;  %1619 = vrot.lane.b32.xlu1 %v5300_v20, %s5094_s24 }
 0x2a4   : > { %1811 = vrot.lane.b32.xlu0 %v5300_v20, %s5095_s26 }
 0x2a5   : > { %v1636_v14 = vpop.permute.xlu1 %1635 }
 0x2a6   : > { %1668 = vst.msk [vmem:[#allocation2 + $0xf9] sm:$0x1] %vm880_vm1, %v1636_v14  ;;  %v1828_v24 = vpop.permute.xlu0 %1827 }
 0x2a7   : > { %1860 = vst.msk [vmem:[#allocation2 + $0xfc] sm:$0x1] %vm880_vm1, %v1828_v24  ;;  %1747 = vrot.lane.b32.xlu1 %v5300_v20, %s5096_s29 }
 0x2a8   : > { %1939 = vrot.lane.b32.xlu0 %v5300_v20, %s5097_s30 }
 0x2a9   : > { %v1764_v3 = vpop.permute.xlu1 %1763  ;;  %v2083_v27 = vld [vmem:[#allocation2 + $0xf0] sm:$0xff] }
 0x2aa   : > { %1796 = vst.msk [vmem:[#allocation2 + $0xfb] sm:$0x1] %vm880_vm1, %v1764_v3  ;;  %v1956_v19 = vpop.permute.xlu0 %1955  ;;  %v2179_v28 = vsel %vm2087_vm2, %v2083_v27, 0 }
 0x2ab   : > { %1988 = vst.msk [vmem:[#allocation2 + $0xfe] sm:$0x1] %vm880_vm1, %v1956_v19  ;;  %1875 = vrot.lane.b32.xlu1 %v5300_v20, %s5098_s5  ;;  %v6071_v38 = vand.u32 4294901760, %v2179_v28 }
 0x2ac   : > { %977 = vrot.lane.b32.xlu0 %v5322_v37, %s5094_s24 }
 0x2ad   : > { %v1892_v18 = vpop.permute.xlu1 %1891  ;;  %v6076_v60 = vsub.f32 %v2179_v28, %v6071_v38 }
 0x2ae   : > { %1924 = vst.msk [vmem:[#allocation2 + $0xfd] sm:$0x1] %vm880_vm1, %v1892_v18  ;;  %v970_v40 = vpop.permute.xlu0 %969 }
 0x2af   : > { %1013 = vst.msk [vmem:[#allocation2 + $0x41] sm:$0x1] %vm880_vm1, %v970_v40  ;;  %4573 = vmatprep.mubr.f32.mxu1 %v6076_v60  ;;  %2003 = vrot.lane.b32.xlu1 %v5300_v20, %s5099_s6 }
 0x2b0   : > { %1105 = vrot.lane.b32.xlu0 %v5322_v37, %s5096_s29 }
 0x2b1   : > { %v2020_v58 = vpop.permute.xlu1 %2019 }
 0x2b2   : > { %2052 = vst.msk [vmem:[#allocation2 + $0xff] sm:$0x1] %vm880_vm1, %v2020_v58  ;;  %v1098_v14 = vpop.permute.xlu0 %1097 }
 0x2b3   : > { %1141 = vst.msk [vmem:[#allocation2 + $0x43] sm:$0x1] %vm880_vm1, %v1098_v14  ;;  %1041 = vrot.lane.b32.xlu1 %v5322_v37, %s5093_s22 }
 0x2b4   : > { %1233 = vrot.lane.b32.xlu0 %v5322_v37, %s5098_s5 }
 0x2b5   : > { %v1034_v24 = vpop.permute.xlu1 %1033 }
 0x2b6   : > { %1077 = vst.msk [vmem:[#allocation2 + $0x42] sm:$0x1] %vm880_vm1, %v1034_v24  ;;  %v1226_v3 = vpop.permute.xlu0 %1225 }
 0x2b7   : > { %1269 = vst.msk [vmem:[#allocation2 + $0x45] sm:$0x1] %vm880_vm1, %v1226_v3  ;;  %1169 = vrot.lane.b32.xlu1 %v5322_v37, %s5095_s26 }
 0x2b8   : > { %1361 = vrot.lane.b32.xlu0 %v5322_v37, %s5099_s6 }
 0x2b9   : > { %v1162_v20 = vpop.permute.xlu1 %1161  ;;  %v2084_v27 = vld [vmem:[#allocation2 + $0xf8] sm:$0xff] }
 0x2ba   : > { %1205 = vst.msk [vmem:[#allocation2 + $0x44] sm:$0x1] %vm880_vm1, %v1162_v20  ;;  %v1354_v19 = vpop.permute.xlu0 %1353  ;;  %v2182_v28 = vsel %vm2087_vm2, %v2084_v27, 0 }
 0x2bb   : > { %1397 = vst.msk [vmem:[#allocation2 + $0x47] sm:$0x1] %vm880_vm1, %v1354_v19  ;;  %1297 = vrot.lane.b32.xlu1 %v5322_v37, %s5097_s30  ;;  %v6102_v18 = vand.u32 4294901760, %v2182_v28 }
 0x2bc   : > { %1685 = vrot.lane.b32.xlu0 %v5361_v56, %s5093_s22 }
 0x2bd   : > { %v1290_v40 = vpop.permute.xlu1 %1289  ;;  %v6107_v58 = vsub.f32 %v2182_v28, %v6102_v18 }
 0x2be   : > { %1333 = vst.msk [vmem:[#allocation2 + $0x46] sm:$0x1] %vm880_vm1, %v1290_v40  ;;  %v1678_v14 = vpop.permute.xlu0 %1677  ;;  %v2574_v40 = vand.u32 4294901760, %v5556_v47 }
 0x2bf   : > { %1721 = vst.msk [vmem:[#allocation2 + $0x4a] sm:$0x1] %vm880_vm1, %v1678_v14  ;;  %4574 = vmatmul.mubr.f32.gmra.mrb[10].mxu1 %v6107_v58  ;;  %1621 = vrot.lane.b32.xlu1 %v5361_v56, %s5094_s24 }
 0x2c0   : > { %1813 = vrot.lane.b32.xlu0 %v5361_v56, %s5095_s26  ;;  %4580 = vmatprep.mubr.f32.mxu1 %v2253_v34 }
 0x2c1   : > { %v1614_v37 = vpop.permute.xlu1 %1613 }
 0x2c2   : > { %1657 = vst.msk [vmem:[#allocation2 + $0x49] sm:$0x1] %vm880_vm1, %v1614_v37  ;;  %v1806_v24 = vpop.permute.xlu0 %1805 }
 0x2c3   : > { %1849 = vst.msk [vmem:[#allocation2 + $0x4c] sm:$0x1] %vm880_vm1, %v1806_v24  ;;  %4581 = vmatmul.mubr.f32.vlgmr.msra.gmra.mrb[12].mxu1 %v2263_v5  ;;  %1749 = vrot.lane.b32.xlu1 %v5361_v56, %s5096_s29 }
 0x2c4   : > { %1941 = vrot.lane.b32.xlu0 %v5361_v56, %s5097_s30  ;;  %4583 = vmatprep.mubr.f32.mxu1 %v2273_v23 }
 0x2c5   : > { %v1742_v3 = vpop.permute.xlu1 %1741  ;;  %v2061_v34 = vld [vmem:[#allocation2 + $0x40] sm:$0xff] }
 0x2c6   : > { %1785 = vst.msk [vmem:[#allocation2 + $0x4b] sm:$0x1] %vm880_vm1, %v1742_v3  ;;  %v1934_v20 = vpop.permute.xlu0 %1933  ;;  %v2113_v27 = vsel %vm2087_vm2, %v2061_v34, 0 }
 0x2c7   : > { %1977 = vst.msk [vmem:[#allocation2 + $0x4e] sm:$0x1] %vm880_vm1, %v1934_v20  ;;  %4584 = vmatmul.mubr.f32.gmra.mrb[14].mxu1 %v2283_v52  ;;  %1877 = vrot.lane.b32.xlu1 %v5361_v56, %s5098_s5  ;;  %v6135_v5 = vand.u32 4294901760, %v2113_v27 }
 0x2c8   : > { %979 = vrot.lane.b32.xlu0 %v5332_v45, %s5094_s24  ;;  %4586 = vmatprep.mubr.f32.mxu1 %v2293_v11  ;;  %v6682_v11 = vand.u32 4294901760, %v5561_v48 }
 0x2c9   : > { %v1870_v23 = vpop.permute.xlu1 %1869  ;;  %v6142_v19 = vsub.f32 %v2113_v27, %v6135_v5 }
 0x2ca   : > { %1913 = vst.msk [vmem:[#allocation2 + $0x4d] sm:$0x1] %vm880_vm1, %v1870_v23  ;;  %v972_v28 = vpop.permute.xlu0 %971 }
 0x2cb   : > { %6704 = vst [vmem:[#allocation10_spill] sm:$0xff] %v6142_v19  ;;  %1014 = vst.msk [vmem:[#allocation2 + $0x51] sm:$0x1] %vm880_vm1, %v972_v28  ;;  %4587 = vmatmul.mubr.f32.gmra.mrb[16].mxu1 %v2303_v31  ;;  %2005 = vrot.lane.b32.xlu1 %v5361_v56, %s5099_s6  ;;  %v2333_v52 = vand.u32 4294901760, %v6142_v19  ;;  %v4748_v56 = vpack.c.bf16 %v6682_v11, %v2574_v40 }
 0x2cc   : > { %1107 = vrot.lane.b32.xlu0 %v5332_v45, %s5096_s29  ;;  %4589 = vmatprep.mubr.f32.mxu1 %v2313_v21 }
 0x2cd   : > { %v1998_v14 = vpop.permute.xlu1 %1997  ;;  %v2334_v37 = vsub.f32 %v6142_v19, %v2333_v52  ;;  %4749 = vmatprep.subr.bf16.mxu1 %v4748_v56 }
 0x2ce   : > { %2041 = vst.msk [vmem:[#allocation2 + $0x4f] sm:$0x1] %vm880_vm1, %v1998_v14  ;;  %v1100_v31 = vpop.permute.xlu0 %1099  ;;  %4751 = vmatpush3.bf16.msra.mxu1 %v4748_v56 }
 0x2cf   : > { %1142 = vst.msk [vmem:[#allocation2 + $0x53] sm:$0x1] %vm880_vm1, %v1100_v31  ;;  %4590 = vmatmul.mubr.f32.gmra.mrb[18].mxu1 %v2323_v35  ;;  %1043 = vrot.lane.b32.xlu1 %v5332_v45, %s5093_s22  ;;  %v2335_v21 = vand.u32 4294901760, %v2334_v37 }
 0x2d0   : > { %1235 = vrot.lane.b32.xlu0 %v5332_v45, %s5098_s5  ;;  %4592 = vmatprep.mubr.f32.mxu1 %v2333_v52 }
 0x2d1   : > { %4436 = vmatprep.mubr.f32.mxu0 %v2335_v21  ;;  %v1036_v24 = vpop.permute.xlu1 %1035  ;;  %4753 = vmatprep.subr.bf16.mxu1 %v5416_v13 }
 0x2d2   : > { %1078 = vst.msk [vmem:[#allocation2 + $0x52] sm:$0x1] %vm880_vm1, %v1036_v24  ;;  %v1228_v3 = vpop.permute.xlu0 %1227 }
 0x2d3   : > { %1270 = vst.msk [vmem:[#allocation2 + $0x55] sm:$0x1] %vm880_vm1, %v1228_v3  ;;  %1171 = vrot.lane.b32.xlu1 %v5332_v45, %s5095_s26 }
 0x2d4   : > { %1363 = vrot.lane.b32.xlu0 %v5332_v45, %s5099_s6 }
 0x2d5   : > { %v1164_v35 = vpop.permute.xlu1 %1163  ;;  %v2062_v34 = vld [vmem:[#allocation2 + $0x48] sm:$0xff] }
 0x2d6   : > { %1206 = vst.msk [vmem:[#allocation2 + $0x54] sm:$0x1] %vm880_vm1, %v1164_v35  ;;  %v1356_v20 = vpop.permute.xlu0 %1355  ;;  %v2116_v27 = vsel %vm2087_vm2, %v2062_v34, 0 }
 0x2d7   : > { %1398 = vst.msk [vmem:[#allocation2 + $0x57] sm:$0x1] %vm880_vm1, %v1356_v20  ;;  %1299 = vrot.lane.b32.xlu1 %v5332_v45, %s5097_s30  ;;  %v6182_v23 = vand.u32 4294901760, %v2116_v27 }
 0x2d8   : > { %1687 = vrot.lane.b32.xlu0 %v5368_v61, %s5093_s22 }
 0x2d9   : > { %v1292_v28 = vpop.permute.xlu1 %1291  ;;  %v6187_v52 = vsub.f32 %v2116_v27, %v6182_v23 }
 0x2da   : > { %1334 = vst.msk [vmem:[#allocation2 + $0x56] sm:$0x1] %vm880_vm1, %v1292_v28  ;;  %v1680_v14 = vpop.permute.xlu0 %1679 }
 0x2db   : > { %6705 = vst [vmem:[#allocation11_spill] sm:$0xff] %v6187_v52  ;;  %1722 = vst.msk [vmem:[#allocation2 + $0x5a] sm:$0x1] %vm880_vm1, %v1680_v14  ;;  %1623 = vrot.lane.b32.xlu1 %v5368_v61, %s5094_s24  ;;  %v2343_v37 = vand.u32 4294901760, %v6187_v52 }
 0x2dc   : > { %1815 = vrot.lane.b32.xlu0 %v5368_v61, %s5095_s26  ;;  %s6621_s26 = scalar_lea.hbm %s6681_s4, %s4215_s14 }
 0x2dd   : > { %4593 = vmatmul.mubr.f32.gmra.mrb[20].mxu1 %v2343_v37  ;;  %v1616_v45 = vpop.permute.xlu1 %1615  ;;  %v2344_v56 = vsub.f32 %v6187_v52, %v2343_v37 }
 0x2de   : > { %1658 = vst.msk [vmem:[#allocation2 + $0x59] sm:$0x1] %vm880_vm1, %v1616_v45  ;;  %v1808_v31 = vpop.permute.xlu0 %1807 }
 0x2df   : > { %1850 = vst.msk [vmem:[#allocation2 + $0x5c] sm:$0x1] %vm880_vm1, %v1808_v31  ;;  %1751 = vrot.lane.b32.xlu1 %v5368_v61, %s5096_s29  ;;  %v2345_v21 = vand.u32 4294901760, %v2344_v56  ;;  %s5010_s29 = scalar_lea.vmem %s6623_s21, 1024 }
 0x2e0   : > { %1943 = vrot.lane.b32.xlu0 %v5368_v61, %s5097_s30  ;;  %p5011_p12 = scmp.ne.s32.totalorder %s6623_s21, %s5010_s29 }
 0x2e1   : > { %4437 = vmatmul.mubr.f32.gmra.mrb[12].mxu0 %v2345_v21  ;;  %v1744_v24 = vpop.permute.xlu1 %1743  ;;  %v2063_v3 = vld [vmem:[#allocation2 + $0x50] sm:$0xff] }
 0x2e2   : > { %1786 = vst.msk [vmem:[#allocation2 + $0x5b] sm:$0x1] %vm880_vm1, %v1744_v24  ;;  %v1936_v35 = vpop.permute.xlu0 %1935  ;;  %v2119_v34 = vsel %vm2087_vm2, %v2063_v3, 0  ;;  %p5012_p13 = pnand %p5011_p12, %p5168_p4 }
 0x2e3   : > { %1978 = vst.msk [vmem:[#allocation2 + $0x5e] sm:$0x1] %vm880_vm1, %v1936_v35  ;;  %1879 = vrot.lane.b32.xlu1 %v5368_v61, %s5098_s5  ;;  %v6208_v20 = vand.u32 4294901760, %v2119_v34 }
 0x2e4   : > { %p5013_p0 = pneg %p5012_p13 }
 0x2e5   : > { %v1872_v27 = vpop.permute.xlu1 %1871  ;;  %v6211_v28 = vsub.f32 %v2119_v34, %v6208_v20 }
 0x2e6   : > { %1914 = vst.msk [vmem:[#allocation2 + $0x5d] sm:$0x1] %vm880_vm1, %v1872_v27  ;;  %v974_v14 = vpop.permute.xlu0 %973 }
 0x2e7   : > { %6706 = vst [vmem:[#allocation12_spill] sm:$0xff] %v6211_v28  ;;  %1015 = vst.msk [vmem:[#allocation2 + $0x61] sm:$0x1] %vm880_vm1, %v974_v14  ;;  %2007 = vrot.lane.b32.xlu1 %v5368_v61, %s5099_s6  ;;  %v2353_v37 = vand.u32 4294901760, %v6211_v28 }
 0x2e9   : > { %v2000_v45 = vpop.permute.xlu1 %1999  ;;  %4595 = vmatprep.mubr.f32.mxu1 %v2353_v37  ;;  %v2354_v56 = vsub.f32 %v6211_v28, %v2353_v37 }
 0x2ea   : > { %2042 = vst.msk [vmem:[#allocation2 + $0x5f] sm:$0x1] %vm880_vm1, %v2000_v45  ;;  %v1102_v31 = vpop.permute.xlu0 %1101 }
 0x2eb   : > { %1143 = vst.msk [vmem:[#allocation2 + $0x63] sm:$0x1] %vm880_vm1, %v1102_v31  ;;  %v2355_v21 = vand.u32 4294901760, %v2354_v56 }
 0x2ed   : > { %v1038_v24 = vpop.permute.xlu1 %1037  ;;  %4439 = vmatprep.mubr.f32.mxu0 %v2355_v21 }
 0x2ee   : > { %1079 = vst.msk [vmem:[#allocation2 + $0x62] sm:$0x1] %vm880_vm1, %v1038_v24  ;;  %v1230_v3 = vpop.permute.xlu0 %1229 }
 0x2ef   : > { %1271 = vst.msk [vmem:[#allocation2 + $0x65] sm:$0x1] %vm880_vm1, %v1230_v3 }
 0x2f1   : > { %v1166_v61 = vpop.permute.xlu1 %1165  ;;  %v2064_v35 = vld [vmem:[#allocation2 + $0x58] sm:$0xff] }
 0x2f2   : > { %1207 = vst.msk [vmem:[#allocation2 + $0x64] sm:$0x1] %vm880_vm1, %v1166_v61  ;;  %v1358_v34 = vpop.permute.xlu0 %1357  ;;  %v2122_v27 = vsel %vm2087_vm2, %v2064_v35, 0 }
 0x2f3   : > { %1399 = vst.msk [vmem:[#allocation2 + $0x67] sm:$0x1] %vm880_vm1, %v1358_v34  ;;  %v6226_v14 = vand.u32 4294901760, %v2122_v27 }
 0x2f5   : > { %v1294_v37 = vpop.permute.xlu1 %1293  ;;  %v6229_v45 = vsub.f32 %v2122_v27, %v6226_v14 }
 0x2f6   : > { %1335 = vst.msk [vmem:[#allocation2 + $0x66] sm:$0x1] %vm880_vm1, %v1294_v37  ;;  %v1682_v56 = vpop.permute.xlu0 %1681 }
 0x2f7   : > { %6707 = vst [vmem:[#allocation13_spill] sm:$0xff] %v6229_v45  ;;  %1723 = vst.msk [vmem:[#allocation2 + $0x6a] sm:$0x1] %vm880_vm1, %v1682_v56  ;;  %v2363_v31 = vand.u32 4294901760, %v6229_v45 }
 0x2f9   : > { %v1618_v21 = vpop.permute.xlu1 %1617  ;;  %4596 = vmatmul.mubr.f32.gmra.mrb[22].mxu1 %v2363_v31  ;;  %v2364_v24 = vsub.f32 %v6229_v45, %v2363_v31 }
 0x2fa   : > { %1659 = vst.msk [vmem:[#allocation2 + $0x69] sm:$0x1] %vm880_vm1, %v1618_v21  ;;  %v1810_v3 = vpop.permute.xlu0 %1809 }
 0x2fb   : > { %1851 = vst.msk [vmem:[#allocation2 + $0x6c] sm:$0x1] %vm880_vm1, %v1810_v3  ;;  %v2365_v61 = vand.u32 4294901760, %v2364_v24 }
 0x2fd   : > { %v1746_v35 = vpop.permute.xlu1 %1745  ;;  %4440 = vmatmul.mubr.f32.gmra.mrb[14].mxu0 %v2365_v61  ;;  %v2065_v34 = vld [vmem:[#allocation2 + $0x60] sm:$0xff] }
 0x2fe   : > { %1787 = vst.msk [vmem:[#allocation2 + $0x6b] sm:$0x1] %vm880_vm1, %v1746_v35  ;;  %v1938_v27 = vpop.permute.xlu0 %1937  ;;  %v2125_v37 = vsel %vm2087_vm2, %v2065_v34, 0  ;;  %v2575_v35 = vsub.f32 %v5556_v47, %v2574_v40  ;;  %v6709_v34 = vand.u32 4294901760, %v5561_v48 }
 0x2ff   : > { %1979 = vst.msk [vmem:[#allocation2 + $0x6e] sm:$0x1] %vm880_vm1, %v1938_v27  ;;  %v6240_v56 = vand.u32 4294901760, %v2125_v37 }
 0x300   : > { %v2582_v27 = vsub.f32 %v5561_v48, %v6709_v34 }
 0x301   : > { %v1874_v11 = vpop.permute.xlu1 %1873  ;;  %v6243_v31 = vsub.f32 %v2125_v37, %v6240_v56 }
 0x302   : > { %1915 = vst.msk [vmem:[#allocation2 + $0x6d] sm:$0x1] %vm880_vm1, %v1874_v11  ;;  %v976_v21 = vpop.permute.xlu0 %975  ;;  %v2583_v45 = vand.u32 4294901760, %v2582_v27 }
 0x303   : > { %6708 = vst [vmem:[#allocation14_spill] sm:$0xff] %v6243_v31  ;;  %1016 = vst.msk [vmem:[#allocation2 + $0x71] sm:$0x1] %vm880_vm1, %v976_v21  ;;  %v2373_v24 = vand.u32 4294901760, %v6243_v31  ;;  %v2576_v21 = vand.u32 4294901760, %v2575_v35 }
 0x305   : > { %v2002_v3 = vpop.permute.xlu1 %2001  ;;  %4598 = vmatprep.mubr.f32.mxu1 %v2373_v24  ;;  %v2374_v61 = vsub.f32 %v6243_v31, %v2373_v24  ;;  %v4736_v52 = vpack.c.bf16 %v2583_v45, %v2576_v21 }
 0x306   : > { %2043 = vst.msk [vmem:[#allocation2 + $0x6f] sm:$0x1] %vm880_vm1, %v2002_v3  ;;  %v1104_v11 = vpop.permute.xlu0 %1103 }
 0x307   : > { %1144 = vst.msk [vmem:[#allocation2 + $0x73] sm:$0x1] %vm880_vm1, %v1104_v11  ;;  %v2375_v37 = vand.u32 4294901760, %v2374_v61  ;;  %4737 = vmatprep.subr.bf16.mxu0 %v4736_v52 }
 0x308   : > { %4739 = vmatpush3.bf16.msra.mxu0 %v4736_v52 }
 0x309   : > { %4442 = vmatprep.mubr.f32.mxu0 %v2375_v37  ;;  %v1040_v28 = vpop.permute.xlu1 %1039  ;;  %4741 = vmatprep.subr.bf16.mxu0 %v5569_v53 }
 0x30a   : > { %1080 = vst.msk [vmem:[#allocation2 + $0x72] sm:$0x1] %vm880_vm1, %v1040_v28  ;;  %v1232_v24 = vpop.permute.xlu0 %1231 }
 0x30b   : > { %1272 = vst.msk [vmem:[#allocation2 + $0x75] sm:$0x1] %vm880_vm1, %v1232_v24 }
 0x30d   : > { %v1168_v47 = vpop.permute.xlu1 %1167  ;;  %v2066_v48 = vld [vmem:[#allocation2 + $0x68] sm:$0xff] }
 0x30e   : > { %1208 = vst.msk [vmem:[#allocation2 + $0x74] sm:$0x1] %vm880_vm1, %v1168_v47  ;;  %v1360_v40 = vpop.permute.xlu0 %1359  ;;  %v2128_v3 = vsel %vm2087_vm2, %v2066_v48, 0 }
 0x30f   : > { %1400 = vst.msk [vmem:[#allocation2 + $0x77] sm:$0x1] %vm880_vm1, %v1360_v40  ;;  %v6263_v61 = vand.u32 4294901760, %v2128_v3 }
 0x311   : > { %v1296_v45 = vpop.permute.xlu1 %1295  ;;  %v6266_v28 = vsub.f32 %v2128_v3, %v6263_v61 }
 0x312   : > { %1336 = vst.msk [vmem:[#allocation2 + $0x76] sm:$0x1] %vm880_vm1, %v1296_v45  ;;  %v1684_v52 = vpop.permute.xlu0 %1683 }
 0x313   : > { %6710 = vst [vmem:[#allocation15_spill] sm:$0xff] %v6266_v28  ;;  %1724 = vst.msk [vmem:[#allocation2 + $0x7a] sm:$0x1] %vm880_vm1, %v1684_v52  ;;  %v2383_v35 = vand.u32 4294901760, %v6266_v28 }
 0x315   : > { %4599 = vmatmul.mubr.f32.gmra.mrb[24].mxu1 %v2383_v35  ;;  %v1620_v34 = vpop.permute.xlu1 %1619  ;;  %v2384_v27 = vsub.f32 %v6266_v28, %v2383_v35 }
 0x316   : > { %1660 = vst.msk [vmem:[#allocation2 + $0x79] sm:$0x1] %vm880_vm1, %v1620_v34  ;;  %v1812_v11 = vpop.permute.xlu0 %1811 }
 0x317   : > { %1852 = vst.msk [vmem:[#allocation2 + $0x7c] sm:$0x1] %vm880_vm1, %v1812_v11  ;;  %v2385_v37 = vand.u32 4294901760, %v2384_v27 }
 0x319   : > { %4443 = vmatmul.mubr.f32.gmra.mrb[16].mxu0 %v2385_v37  ;;  %v1748_v21 = vpop.permute.xlu1 %1747  ;;  %v2067_v24 = vld [vmem:[#allocation2 + $0x70] sm:$0xff] }
 0x31a   : > { %1788 = vst.msk [vmem:[#allocation2 + $0x7b] sm:$0x1] %vm880_vm1, %v1748_v21  ;;  %v1940_v47 = vpop.permute.xlu0 %1939  ;;  %v2131_v48 = vsel %vm2087_vm2, %v2067_v24, 0 }
 0x31b   : > { %1980 = vst.msk [vmem:[#allocation2 + $0x7e] sm:$0x1] %vm880_vm1, %v1940_v47  ;;  %v6277_v40 = vand.u32 4294901760, %v2131_v48 }
 0x31d   : > { %v1876_v3 = vpop.permute.xlu1 %1875  ;;  %v6280_v45 = vsub.f32 %v2131_v48, %v6277_v40 }
 0x31e   : > { %1916 = vst.msk [vmem:[#allocation2 + $0x7d] sm:$0x1] %vm880_vm1, %v1876_v3  ;;  %v978_v52 = vpop.permute.xlu0 %977 }
 0x31f   : > { %6711 = vst [vmem:[#allocation16_spill] sm:$0xff] %v6280_v45  ;;  %1017 = vst.msk [vmem:[#allocation2 + $0x81] sm:$0x1] %vm880_vm1, %v978_v52  ;;  %v2393_v35 = vand.u32 4294901760, %v6280_v45 }
 0x321   : > { %v2004_v34 = vpop.permute.xlu1 %2003  ;;  %4601 = vmatprep.mubr.f32.mxu1 %v2393_v35  ;;  %v2394_v27 = vsub.f32 %v6280_v45, %v2393_v35 }
 0x322   : > { %2044 = vst.msk [vmem:[#allocation2 + $0x7f] sm:$0x1] %vm880_vm1, %v2004_v34  ;;  %v1106_v11 = vpop.permute.xlu0 %1105 }
 0x323   : > { %1145 = vst.msk [vmem:[#allocation2 + $0x83] sm:$0x1] %vm880_vm1, %v1106_v11  ;;  %v2395_v37 = vand.u32 4294901760, %v2394_v27 }
 0x325   : > { %v1042_v21 = vpop.permute.xlu1 %1041  ;;  %4445 = vmatprep.mubr.f32.mxu0 %v2395_v37 }
 0x326   : > { %1081 = vst.msk [vmem:[#allocation2 + $0x82] sm:$0x1] %vm880_vm1, %v1042_v21  ;;  %v1234_v24 = vpop.permute.xlu0 %1233 }
 0x327   : > { %1273 = vst.msk [vmem:[#allocation2 + $0x85] sm:$0x1] %vm880_vm1, %v1234_v24 }
 0x329   : > { %v1170_v47 = vpop.permute.xlu1 %1169  ;;  %v2068_v48 = vld [vmem:[#allocation2 + $0x78] sm:$0xff] }
 0x32a   : > { %1209 = vst.msk [vmem:[#allocation2 + $0x84] sm:$0x1] %vm880_vm1, %v1170_v47  ;;  %v1362_v3 = vpop.permute.xlu0 %1361  ;;  %v2134_v52 = vsel %vm2087_vm2, %v2068_v48, 0 }
 0x32b   : > { %1401 = vst.msk [vmem:[#allocation2 + $0x87] sm:$0x1] %vm880_vm1, %v1362_v3  ;;  %v6293_v35 = vand.u32 4294901760, %v2134_v52 }
 0x32d   : > { %v1298_v34 = vpop.permute.xlu1 %1297  ;;  %v6296_v27 = vsub.f32 %v2134_v52, %v6293_v35 }
 0x32e   : > { %1337 = vst.msk [vmem:[#allocation2 + $0x86] sm:$0x1] %vm880_vm1, %v1298_v34  ;;  %v1686_v11 = vpop.permute.xlu0 %1685 }
 0x32f   : > { %6712 = vst [vmem:[#allocation17_spill] sm:$0xff] %v6296_v27  ;;  %1725 = vst.msk [vmem:[#allocation2 + $0x8a] sm:$0x1] %vm880_vm1, %v1686_v11  ;;  %v2403_v37 = vand.u32 4294901760, %v6296_v27 }
 0x331   : > { %v1622_v21 = vpop.permute.xlu1 %1621  ;;  %4602 = vmatmul.mubr.f32.gmra.mrb[26].mxu1 %v2403_v37  ;;  %v2404_v24 = vsub.f32 %v6296_v27, %v2403_v37 }
 0x332   : > { %1661 = vst.msk [vmem:[#allocation2 + $0x89] sm:$0x1] %vm880_vm1, %v1622_v21  ;;  %v1814_v47 = vpop.permute.xlu0 %1813 }
 0x333   : > { %1853 = vst.msk [vmem:[#allocation2 + $0x8c] sm:$0x1] %vm880_vm1, %v1814_v47  ;;  %v2405_v48 = vand.u32 4294901760, %v2404_v24 }
 0x335   : > { %v1750_v3 = vpop.permute.xlu1 %1749  ;;  %4446 = vmatmul.mubr.f32.gmra.mrb[18].mxu0 %v2405_v48  ;;  %v2069_v52 = vld [vmem:[#allocation2 + $0x80] sm:$0xff] }
 0x336   : > { %1789 = vst.msk [vmem:[#allocation2 + $0x8b] sm:$0x1] %vm880_vm1, %v1750_v3  ;;  %v1942_v34 = vpop.permute.xlu0 %1941  ;;  %v2137_v11 = vsel %vm2087_vm2, %v2069_v52, 0 }
 0x337   : > { %1981 = vst.msk [vmem:[#allocation2 + $0x8e] sm:$0x1] %vm880_vm1, %v1942_v34  ;;  %v6307_v45 = vand.u32 4294901760, %v2137_v11 }
 0x339   : > { %v1878_v28 = vpop.permute.xlu1 %1877  ;;  %v6310_v37 = vsub.f32 %v2137_v11, %v6307_v45 }
 0x33a   : > { %1917 = vst.msk [vmem:[#allocation2 + $0x8d] sm:$0x1] %vm880_vm1, %v1878_v28  ;;  %v980_v21 = vpop.permute.xlu0 %979 }
 0x33b   : > { %6713 = vst [vmem:[#allocation18_spill] sm:$0xff] %v6310_v37  ;;  %1018 = vst.msk [vmem:[#allocation2 + $0x91] sm:$0x1] %vm880_vm1, %v980_v21  ;;  %v2413_v24 = vand.u32 4294901760, %v6310_v37 }
 0x33d   : > { %v2006_v47 = vpop.permute.xlu1 %2005  ;;  %4604 = vmatprep.mubr.f32.mxu1 %v2413_v24  ;;  %v2414_v48 = vsub.f32 %v6310_v37, %v2413_v24 }
 0x33e   : > { %2045 = vst.msk [vmem:[#allocation2 + $0x8f] sm:$0x1] %vm880_vm1, %v2006_v47  ;;  %v1108_v3 = vpop.permute.xlu0 %1107 }
 0x33f   : > { %1146 = vst.msk [vmem:[#allocation2 + $0x93] sm:$0x1] %vm880_vm1, %v1108_v3  ;;  %v2415_v52 = vand.u32 4294901760, %v2414_v48 }
 0x341   : > { %v1044_v34 = vpop.permute.xlu1 %1043  ;;  %4448 = vmatprep.mubr.f32.mxu0 %v2415_v52 }
 0x342   : > { %1082 = vst.msk [vmem:[#allocation2 + $0x92] sm:$0x1] %vm880_vm1, %v1044_v34  ;;  %v1236_v28 = vpop.permute.xlu0 %1235 }
 0x343   : > { %1274 = vst.msk [vmem:[#allocation2 + $0x95] sm:$0x1] %vm880_vm1, %v1236_v28 }
 0x345   : > { %v1172_v11 = vpop.permute.xlu1 %1171  ;;  %v2070_v21 = vld [vmem:[#allocation2 + $0x88] sm:$0xff] }
 0x346   : > { %1210 = vst.msk [vmem:[#allocation2 + $0x94] sm:$0x1] %vm880_vm1, %v1172_v11  ;;  %v1364_v27 = vpop.permute.xlu0 %1363  ;;  %v2140_v24 = vsel %vm2087_vm2, %v2070_v21, 0 }
 0x347   : > { %1402 = vst.msk [vmem:[#allocation2 + $0x97] sm:$0x1] %vm880_vm1, %v1364_v27  ;;  %v6323_v47 = vand.u32 4294901760, %v2140_v24 }
 0x349   : > { %v1300_v3 = vpop.permute.xlu1 %1299  ;;  %v6326_v48 = vsub.f32 %v2140_v24, %v6323_v47 }
 0x34a   : > { %1338 = vst.msk [vmem:[#allocation2 + $0x96] sm:$0x1] %vm880_vm1, %v1300_v3  ;;  %v1688_v52 = vpop.permute.xlu0 %1687 }
 0x34b   : > { %6714 = vst [vmem:[#allocation19_spill] sm:$0xff] %v6326_v48  ;;  %1726 = vst.msk [vmem:[#allocation2 + $0x9a] sm:$0x1] %vm880_vm1, %v1688_v52  ;;  %v2423_v34 = vand.u32 4294901760, %v6326_v48 }
 0x34d   : > { %v1624_v28 = vpop.permute.xlu1 %1623  ;;  %4605 = vmatmul.mubr.f32.gmra.mrb[28].mxu1 %v2423_v34  ;;  %v2424_v11 = vsub.f32 %v6326_v48, %v2423_v34 }
 0x34e   : > { %1662 = vst.msk [vmem:[#allocation2 + $0x99] sm:$0x1] %vm880_vm1, %v1624_v28  ;;  %v1816_v27 = vpop.permute.xlu0 %1815 }
 0x34f   : > { %1854 = vst.msk [vmem:[#allocation2 + $0x9c] sm:$0x1] %vm880_vm1, %v1816_v27  ;;  %v2425_v21 = vand.u32 4294901760, %v2424_v11 }
 0x351   : > { %v1752_v37 = vpop.permute.xlu1 %1751  ;;  %4449 = vmatmul.mubr.f32.gmra.mrb[20].mxu0 %v2425_v21  ;;  %v2071_v24 = vld [vmem:[#allocation2 + $0x90] sm:$0xff] }
 0x352   : > { %1790 = vst.msk [vmem:[#allocation2 + $0x9b] sm:$0x1] %vm880_vm1, %v1752_v37  ;;  %v1944_v3 = vpop.permute.xlu0 %1943  ;;  %v2143_v52 = vsel %vm2087_vm2, %v2071_v24, 0 }
 0x353   : > { %1982 = vst.msk [vmem:[#allocation2 + $0x9e] sm:$0x1] %vm880_vm1, %v1944_v3  ;;  %v6337_v31 = vand.u32 4294901760, %v2143_v52 }
 0x355   : > { %v1880_v19 = vpop.permute.xlu1 %1879  ;;  %v6340_v34 = vsub.f32 %v2143_v52, %v6337_v31  ;;  %v2453_v52 = vand.u32 4294901760, %v5795_v44 }
 0x356   : > { %1918 = vst.msk [vmem:[#allocation2 + $0x9d] sm:$0x1] %vm880_vm1, %v1880_v19 }
 0x357   : > { %6715 = vst [vmem:[#allocation20_spill] sm:$0xff] %v6340_v34  ;;  %v2433_v28 = vand.u32 4294901760, %v6340_v34 }
 0x359   : > { %v2008_v11 = vpop.permute.xlu1 %2007  ;;  %4607 = vmatprep.mubr.f32.mxu1 %v2433_v28  ;;  %v2434_v27 = vsub.f32 %v6340_v34, %v2433_v28  ;;  %v2454_v28 = vsub.f32 %v5795_v44, %v2453_v52  ;;  %v2483_v34 = vand.u32 4294901760, %v5967_v62 }
 0x35a   : > { %2046 = vst.msk [vmem:[#allocation2 + $0x9f] sm:$0x1] %vm880_vm1, %v2008_v11  ;;  %v2473_v11 = vand.u32 4294901760, %v5894_v36 }
 0x35b   : > { %v2435_v37 = vand.u32 4294901760, %v2434_v27  ;;  %v2455_v57 = vand.u32 4294901760, %v2454_v28  ;;  %v2484_v43 = vsub.f32 %v5967_v62, %v2483_v34  ;;  %v2533_v62 = vand.u32 4294901760, %v6020_v2 }
 0x35d   : > { %4451 = vmatprep.mubr.f32.mxu0 %v2435_v37 }
 0x361   : > { %v2072_v21 = vld [vmem:[#allocation2 + $0x98] sm:$0xff] }
 0x362   : > { %v2146_v24 = vsel %vm2087_vm2, %v2072_v21, 0  ;;  %v2464_v21 = vsub.f32 %v5844_v46, %v2463_v32  ;;  %v2513_v46 = vand.u32 4294901760, %v5991_v10 }
 0x363   : > { %v6347_v3 = vand.u32 4294901760, %v2146_v24 }
 0x364   : > { %v2465_v44 = vand.u32 4294901760, %v2464_v21 }
 0x365   : > { %v6351_v48 = vsub.f32 %v2146_v24, %v6347_v3  ;;  %v2474_v24 = vsub.f32 %v5894_v36, %v2473_v11  ;;  %v2485_v36 = vand.u32 4294901760, %v2484_v43  ;;  %v2534_v43 = vsub.f32 %v6020_v2, %v2533_v62 }
 0x367   : > { %v2443_v19 = vand.u32 4294901760, %v6351_v48 }
 0x369   : > { %4608 = vmatmul.mubr.f32.gmra.mrb[30].mxu1 %v2443_v19  ;;  %v2444_v27 = vsub.f32 %v6351_v48, %v2443_v19  ;;  %v2503_v19 = vand.u32 4294901760, %v5985_v25 }
 0x36a   : > { %4610 = vmatprep.mubr.f32.mxu1 %v2453_v52  ;;  %v2475_v52 = vand.u32 4294901760, %v2474_v24  ;;  %v2563_v24 = vand.u32 4294901760, %v6107_v58 }
 0x36b   : > { %v2445_v37 = vand.u32 4294901760, %v2444_v27  ;;  %v2494_v27 = vsub.f32 %v5975_v9, %v2493_v29  ;;  %v2504_v28 = vsub.f32 %v5985_v25, %v2503_v19  ;;  %v2553_v25 = vand.u32 4294901760, %v6076_v60 }
 0x36c   : > { %v2564_v2 = vsub.f32 %v6107_v58, %v2563_v24 }
 0x36d   : > { %4452 = vmatmul.mubr.f32.gmra.mrb[22].mxu0 %v2445_v37  ;;  %4611 = vmatmul.mubr.f32.gmra.mrb[0].mxu1 %v2463_v32  ;;  %v2495_v32 = vand.u32 4294901760, %v2494_v27  ;;  %v2505_v9 = vand.u32 4294901760, %v2504_v28 }
 0x36e   : > { %4454 = vmatprep.mubr.f32.mxu0 %v2455_v57  ;;  %4613 = vmatprep.mubr.f32.mxu1 %v2473_v11  ;;  %v2523_v57 = vand.u32 4294901760, %v6016_v4  ;;  %v2514_v11 = vsub.f32 %v5991_v10, %v2513_v46  ;;  %v2565_v27 = vand.u32 4294901760, %v2564_v2 }
 0x370   : > { %v2524_v37 = vsub.f32 %v6016_v4, %v2523_v57 }
 0x371   : > { %4455 = vmatmul.mubr.f32.gmra.mrb[24].mxu0 %v2465_v44  ;;  %4614 = vmatmul.mubr.f32.gmra.mrb[2].mxu1 %v2483_v34  ;;  %v2543_v34 = vand.u32 4294901760, %v6051_v0  ;;  %v2535_v44 = vand.u32 4294901760, %v2534_v43 }
 0x372   : > { %4457 = vmatprep.mubr.f32.mxu0 %v2475_v52  ;;  %4616 = vmatprep.mubr.f32.mxu1 %v2493_v29  ;;  %v2515_v29 = vand.u32 4294901760, %v2514_v11  ;;  %v2525_v10 = vand.u32 4294901760, %v2524_v37 }
 0x373   : > { %v2544_v21 = vsub.f32 %v6051_v0, %v2543_v34  ;;  %v6730_v0 = vld [vmem:[#allocation20_spill] sm:$0xff] }
 0x375   : > { %4458 = vmatmul.mubr.f32.gmra.mrb[26].mxu0 %v2485_v36  ;;  %4617 = vmatmul.mubr.f32.gmra.mrb[4].mxu1 %v2503_v19  ;;  %v2554_v19 = vsub.f32 %v6076_v60, %v2553_v25  ;;  %v2545_v4 = vand.u32 4294901760, %v2544_v21 }
 0x376   : > { %4460 = vmatprep.mubr.f32.mxu0 %v2495_v32  ;;  %4619 = vmatprep.mubr.f32.mxu1 %v2513_v46 }
 0x377   : > { %v2555_v52 = vand.u32 4294901760, %v2554_v19 }
 0x379   : > { %4461 = vmatmul.mubr.f32.gmra.mrb[28].mxu0 %v2505_v9  ;;  %4620 = vmatmul.mubr.f32.gmra.mrb[6].mxu1 %v2523_v57 }
 0x37a   : > { %4463 = vmatprep.mubr.f32.mxu0 %v2515_v29  ;;  %4622 = vmatprep.mubr.f32.mxu1 %v2533_v62 }
 0x37d   : > { %4464 = vmatmul.mubr.f32.gmra.mrb[30].mxu0 %v2525_v10  ;;  %4623 = vmatmul.mubr.f32.gmra.mrb[8].mxu1 %v2543_v34 }
 0x37e   : > { %4466 = vmatprep.mubr.f32.mxu0 %v2535_v44  ;;  %4625 = vmatprep.mubr.f32.mxu1 %v2553_v25 }
 0x381   : > { %4467 = vmatmul.mubr.f32.gmra.mrb[32].mxu0 %v2545_v4  ;;  %4626 = vmatmul.mubr.f32.gmra.mrb[10].mxu1 %v2563_v24 }
 0x382   : > { %4469 = vmatprep.mubr.f32.mxu0 %v2555_v52  ;;  %4632 = vmatprep.mubr.f32.mxu1 %v5527_v30 }
 0x385   : > { %4470 = vmatmul.mubr.f32.gmra.mrb[34].mxu0 %v2565_v27  ;;  %4633 = vmatmul.mubr.f32.vlgmr.msra.gmra.mrb[12].mxu1 %v5565_v49 }
 0x386   : > { %4476 = vmatprep.mubr.f32.mxu0 %v5527_v30  ;;  %4635 = vmatprep.mubr.f32.mxu1 %v5606_v8 }
 0x387   : > { %4755 = vmatpush3.bf16.msra.mxu1 %v5416_v13  ;;  %v6716_v13 = vld [vmem:[#allocation6_spill] sm:$0xff] }
 0x389   : > { %4477 = vmatmul.mubr.f32.vlgmr.msra.gmra.mrb[4].mxu0 %v5565_v49  ;;  %4636 = vmatmul.mubr.f32.gmra.mrb[14].mxu1 %v5664_v6 }
 0x38a   : > { %4479 = vmatprep.mubr.f32.mxu0 %v5606_v8  ;;  %4638 = vmatprep.mubr.f32.mxu1 %v5646_v51 }
 0x38b   : > { %4743 = vmatpush3.bf16.msra.mxu0 %v5569_v53  ;;  %v6720_v53 = vld [vmem:[#allocation10_spill] sm:$0xff] }
 0x38d   : > { %4480 = vmatmul.mubr.f32.gmra.mrb[6].mxu0 %v5664_v6  ;;  %4639 = vmatmul.mubr.f32.gmra.mrb[16].mxu1 %v5696_v63 }
 0x38e   : > { %4482 = vmatprep.mubr.f32.mxu0 %v5646_v51  ;;  %4641 = vmatprep.mubr.f32.mxu1 %v5730_v54 }
 0x391   : > { %4483 = vmatmul.mubr.f32.gmra.mrb[8].mxu0 %v5696_v63  ;;  %4642 = vmatmul.mubr.f32.gmra.mrb[18].mxu1 %v5758_v26 }
 0x392   : > { %4485 = vmatprep.mubr.f32.mxu0 %v5730_v54  ;;  %4644 = vmatprep.mubr.f32.mxu1 %v6135_v5 }
 0x395   : > { %4486 = vmatmul.mubr.f32.gmra.mrb[10].mxu0 %v5758_v26  ;;  %4645 = vmatmul.mubr.f32.gmra.mrb[20].mxu1 %v6182_v23 }
 0x396   : > { %4488 = vmatprep.mubr.f32.mxu0 %v6135_v5  ;;  %4647 = vmatprep.mubr.f32.mxu1 %v6208_v20 }
 0x399   : > { %4489 = vmatmul.mubr.f32.gmra.mrb[12].mxu0 %v6182_v23  ;;  %4648 = vmatmul.mubr.f32.gmra.mrb[22].mxu1 %v6226_v14 }
 0x39a   : > { %4491 = vmatprep.mubr.f32.mxu0 %v6208_v20  ;;  %4650 = vmatprep.mubr.f32.mxu1 %v6240_v56 }
 0x39d   : > { %4492 = vmatmul.mubr.f32.gmra.mrb[14].mxu0 %v6226_v14  ;;  %4651 = vmatmul.mubr.f32.gmra.mrb[24].mxu1 %v6263_v61 }
 0x39e   : > { %4494 = vmatprep.mubr.f32.mxu0 %v6240_v56  ;;  %4653 = vmatprep.mubr.f32.mxu1 %v6277_v40 }
 0x3a1   : > { %4495 = vmatmul.mubr.f32.gmra.mrb[16].mxu0 %v6263_v61  ;;  %4654 = vmatmul.mubr.f32.gmra.mrb[26].mxu1 %v6293_v35 }
 0x3a2   : > { %4497 = vmatprep.mubr.f32.mxu0 %v6277_v40  ;;  %4656 = vmatprep.mubr.f32.mxu1 %v6307_v45 }
 0x3a5   : > { %4498 = vmatmul.mubr.f32.gmra.mrb[18].mxu0 %v6293_v35  ;;  %4657 = vmatmul.mubr.f32.gmra.mrb[28].mxu1 %v6323_v47 }
 0x3a6   : > { %4500 = vmatprep.mubr.f32.mxu0 %v6307_v45  ;;  %4659 = vmatprep.mubr.f32.mxu1 %v6337_v31 }
 0x3a9   : > { %4501 = vmatmul.mubr.f32.gmra.mrb[20].mxu0 %v6323_v47  ;;  %4660 = vmatmul.mubr.f32.gmra.mrb[30].mxu1 %v6347_v3 }
 0x3aa   : > { %4503 = vmatprep.mubr.f32.mxu0 %v6337_v31  ;;  %4662 = vmatprep.mubr.f32.mxu1 %v5790_v59 }
 0x3ad   : > { %4504 = vmatmul.mubr.f32.gmra.mrb[22].mxu0 %v6347_v3  ;;  %4663 = vmatmul.mubr.f32.gmra.mrb[0].mxu1 %v5839_v41 }
 0x3ae   : > { %4506 = vmatprep.mubr.f32.mxu0 %v5790_v59  ;;  %4665 = vmatprep.mubr.f32.mxu1 %v5889_v39 }
 0x3b1   : > { %4507 = vmatmul.mubr.f32.gmra.mrb[24].mxu0 %v5839_v41  ;;  %4666 = vmatmul.mubr.f32.gmra.mrb[2].mxu1 %v5962_v16 }
 0x3b2   : > { %4509 = vmatprep.mubr.f32.mxu0 %v5889_v39  ;;  %4668 = vmatprep.mubr.f32.mxu1 %v5957_v50 }
 0x3b5   : > { %4510 = vmatmul.mubr.f32.gmra.mrb[26].mxu0 %v5962_v16  ;;  %4669 = vmatmul.mubr.f32.gmra.mrb[4].mxu1 %v5969_v15 }
 0x3b6   : > { %4512 = vmatprep.mubr.f32.mxu0 %v5957_v50  ;;  %4671 = vmatprep.mubr.f32.mxu1 %v5977_v17 }
 0x3b9   : > { %4513 = vmatmul.mubr.f32.gmra.mrb[28].mxu0 %v5969_v15  ;;  %4672 = vmatmul.mubr.f32.gmra.mrb[6].mxu1 %v6011_v7 }
 0x3ba   : > { %4515 = vmatprep.mubr.f32.mxu0 %v5977_v17  ;;  %4674 = vmatprep.mubr.f32.mxu1 %v6006_v42 }
 0x3bd   : > { %4516 = vmatmul.mubr.f32.gmra.mrb[30].mxu0 %v6011_v7  ;;  %4675 = vmatmul.mubr.f32.gmra.mrb[8].mxu1 %v6046_v1 }
 0x3be   : > { %4518 = vmatprep.mubr.f32.mxu0 %v6006_v42  ;;  %4677 = vmatprep.mubr.f32.mxu1 %v6071_v38 }
 0x3c1   : > { %4519 = vmatmul.mubr.f32.gmra.mrb[32].mxu0 %v6046_v1  ;;  %4678 = vmatmul.mubr.f32.gmra.mrb[10].mxu1 %v6102_v18 }
 0x3c2   : > { %4521 = vmatprep.mubr.f32.mxu0 %v6071_v38  ;;  %4684 = vmatprep.mubr.f32.mxu1 %v5527_v30  ;;  %v6717_v30 = vld [vmem:[#allocation7_spill] sm:$0xff] }
 0x3c5   : > { %4522 = vmatmul.mubr.f32.gmra.mrb[34].mxu0 %v6102_v18  ;;  %4685 = vmatmul.mubr.f32.vlgmr.msra.gmra.mrb[12].mxu1 %v5565_v49  ;;  %v6719_v49 = vld [vmem:[#allocation9_spill] sm:$0xff] }
 0x3c6   : > { %4528 = vmatprep.mubr.f32.mxu0 %v5531_v33  ;;  %4687 = vmatprep.mubr.f32.mxu1 %v5606_v8  ;;  %v6718_v33 = vld [vmem:[#allocation8_spill] sm:$0xff] }
 0x3c7   : > { %v6722_v8 = vld [vmem:[#allocation12_spill] sm:$0xff] }
 0x3c9   : > { %4529 = vmatmul.mubr.f32.vlgmr.msra.gmra.mrb[4].mxu0 %v5573_v55  ;;  %4688 = vmatmul.mubr.f32.gmra.mrb[14].mxu1 %v5664_v6  ;;  %v6721_v55 = vld [vmem:[#allocation11_spill] sm:$0xff] }
 0x3ca   : > { %4531 = vmatprep.mubr.f32.mxu0 %v5610_v22  ;;  %4690 = vmatprep.mubr.f32.mxu1 %v5646_v51  ;;  %v6723_v22 = vld [vmem:[#allocation13_spill] sm:$0xff]  ;;  %v6724_v51 = vld [vmem:[#allocation14_spill] sm:$0xff]  ;;  %v6725_v6 = vld [vmem:[#allocation15_spill] sm:$0xff] }
 0x3cd   : > { %4532 = vmatmul.mubr.f32.gmra.mrb[6].mxu0 %v5669_v12  ;;  %4691 = vmatmul.mubr.f32.gmra.mrb[16].mxu1 %v5696_v63  ;;  %v6726_v12 = vld [vmem:[#allocation16_spill] sm:$0xff]  ;;  %v6727_v63 = vld [vmem:[#allocation17_spill] sm:$0xff] }
 0x3ce   : > { %4534 = vmatprep.mubr.f32.mxu0 %v6716_v13  ;;  %4693 = vmatprep.mubr.f32.mxu1 %v5730_v54  ;;  %v6728_v54 = vld [vmem:[#allocation18_spill] sm:$0xff] }
 0x3d1   : > { %4535 = vmatmul.mubr.f32.gmra.mrb[8].mxu0 %v6717_v30  ;;  %4694 = vmatmul.mubr.f32.gmra.mrb[18].mxu1 %v5758_v26  ;;  %v6729_v26 = vld [vmem:[#allocation19_spill] sm:$0xff] }
 0x3d2   : > { %4537 = vmatprep.mubr.f32.mxu0 %v6718_v33  ;;  %4696 = vmatprep.mubr.f32.mxu1 %v6135_v5 }
 0x3d5   : > { %4538 = vmatmul.mubr.f32.gmra.mrb[10].mxu0 %v6719_v49  ;;  %4697 = vmatmul.mubr.f32.gmra.mrb[20].mxu1 %v6182_v23 }
 0x3d6   : > { %4540 = vmatprep.mubr.f32.mxu0 %v6720_v53  ;;  %4699 = vmatprep.mubr.f32.mxu1 %v6208_v20 }
 0x3d9   : > { %4541 = vmatmul.mubr.f32.gmra.mrb[12].mxu0 %v6721_v55  ;;  %4700 = vmatmul.mubr.f32.gmra.mrb[22].mxu1 %v6226_v14 }
 0x3da   : > { %4543 = vmatprep.mubr.f32.mxu0 %v6722_v8  ;;  %4702 = vmatprep.mubr.f32.mxu1 %v6240_v56 }
 0x3dd   : > { %4544 = vmatmul.mubr.f32.gmra.mrb[14].mxu0 %v6723_v22  ;;  %4703 = vmatmul.mubr.f32.gmra.mrb[24].mxu1 %v6263_v61 }
 0x3de   : > { %4546 = vmatprep.mubr.f32.mxu0 %v6724_v51  ;;  %4705 = vmatprep.mubr.f32.mxu1 %v6277_v40 }
 0x3e1   : > { %4547 = vmatmul.mubr.f32.gmra.mrb[16].mxu0 %v6725_v6  ;;  %4706 = vmatmul.mubr.f32.gmra.mrb[26].mxu1 %v6293_v35 }
 0x3e2   : > { %4549 = vmatprep.mubr.f32.mxu0 %v6726_v12  ;;  %4708 = vmatprep.mubr.f32.mxu1 %v6307_v45 }
 0x3e5   : > { %4550 = vmatmul.mubr.f32.gmra.mrb[18].mxu0 %v6727_v63  ;;  %4709 = vmatmul.mubr.f32.gmra.mrb[28].mxu1 %v6323_v47 }
 0x3e6   : > { %4552 = vmatprep.mubr.f32.mxu0 %v6728_v54  ;;  %4711 = vmatprep.mubr.f32.mxu1 %v6337_v31 }
 0x3e9   : > { %4553 = vmatmul.mubr.f32.gmra.mrb[20].mxu0 %v6729_v26  ;;  %4712 = vmatmul.mubr.f32.gmra.mrb[30].mxu1 %v6347_v3 }
 0x3ea   : > { %4555 = vmatprep.mubr.f32.mxu0 %v6730_v0  ;;  %4714 = vmatprep.mubr.f32.mxu1 %v5790_v59 }
 0x3ed   : > { %4556 = vmatmul.mubr.f32.gmra.mrb[22].mxu0 %v6351_v48  ;;  %4715 = vmatmul.mubr.f32.gmra.mrb[0].mxu1 %v5839_v41 }
 0x3ee   : > { %4717 = vmatprep.mubr.f32.mxu1 %v5889_v39 }
 0x3f1   : > { %4718 = vmatmul.mubr.f32.gmra.mrb[2].mxu1 %v5962_v16 }
 0x3f2   : > { %4720 = vmatprep.mubr.f32.mxu1 %v5957_v50 }
 0x3f5   : > { %4721 = vmatmul.mubr.f32.gmra.mrb[4].mxu1 %v5969_v15 }
 0x3f6   : > { %4723 = vmatprep.mubr.f32.mxu1 %v5977_v17 }
 0x3f9   : > { %4724 = vmatmul.mubr.f32.gmra.mrb[6].mxu1 %v6011_v7 }
 0x3fa   : > { %4726 = vmatprep.mubr.f32.mxu1 %v6006_v42 }
 0x3fd   : > { %4727 = vmatmul.mubr.f32.gmra.mrb[8].mxu1 %v6046_v1 }
 0x3fe   : > { %4729 = vmatprep.mubr.f32.mxu1 %v6071_v38 }
 0x401   : > { %4730 = vmatmul.mubr.f32.gmra.mrb[10].mxu1 %v6102_v18 }
 0x484   : > { %v6496_v59 = vpop.f32.mrb[24].mxu0 }
 0x485   : > { %v6498_v41 = vpop.f32.mrb[25].mxu0 }
 0x488   : > { %v6500_v39 = vpop.f32.mrb[26].mxu0 }
 0x489   : > { %v6502_v50 = vpop.f32.mrb[27].mxu0 }
 0x48c   : > { %v6504_v16 = vpop.f32.mrb[28].mxu0 }
 0x48d   : > { %v6506_v15 = vpop.f32.mrb[29].mxu0 }
 0x490   : > { %v6508_v17 = vpop.f32.mrb[30].mxu0 }
 0x491   : > { %v6510_v42 = vpop.f32.mrb[31].mxu0 }
 0x494   : > { %v6512_v7 = vpop.f32.mrb[32].mxu0 }
 0x495   : > { %v6514_v1 = vpop.f32.mrb[33].mxu0 }
 0x498   : > { %v6516_v38 = vpop.f32.mrb[34].mxu0  ;;  %v4686_v60 = vpop.f32.mrb[12].mxu1 }
 0x499   : > { %v6518_v18 = vpop.f32.mrb[35].mxu0  ;;  %v3786_v58 = vpop.f32.mrb[13].mxu1 }
 0x49c   : > { %v4530_v5 = vpop.f32.mrb[4].mxu0  ;;  %v4689_v23 = vpop.f32.mrb[14].mxu1 }
 0x49d   : > { %v6520_v20 = vadd.f32 %v4686_v60, %v4530_v5  ;;  %v2910_v14 = vpop.f32.mrb[5].mxu0  ;;  %v3798_v56 = vpop.f32.mrb[15].mxu1 }
 0x49e   : > { %v6522_v31 = vadd.f32 %v3786_v58, %v2910_v14 }
 0x4a0   : > { %v4533_v61 = vpop.f32.mrb[6].mxu0  ;;  %v4692_v40 = vpop.f32.mrb[16].mxu1 }
 0x4a1   : > { %v6524_v45 = vadd.f32 %v4689_v23, %v4533_v61  ;;  %v2924_v35 = vpop.f32.mrb[7].mxu0  ;;  %v3810_v47 = vpop.f32.mrb[17].mxu1 }
 0x4a2   : > { %v6526_v48 = vadd.f32 %v3798_v56, %v2924_v35 }
 0x4a4   : > { %v4536_v3 = vpop.f32.mrb[8].mxu0  ;;  %v4695_v46 = vpop.f32.mrb[18].mxu1 }
 0x4a5   : > { %v6528_v36 = vadd.f32 %v4692_v40, %v4536_v3  ;;  %v2938_v28 = vpop.f32.mrb[9].mxu0  ;;  %v3822_v57 = vpop.f32.mrb[19].mxu1 }
 0x4a6   : > { %v6530_v32 = vadd.f32 %v3810_v47, %v2938_v28 }
 0x4a8   : > { %v4539_v11 = vpop.f32.mrb[10].mxu0  ;;  %v4698_v62 = vpop.f32.mrb[20].mxu1 }
 0x4a9   : > { %v6532_v9 = vadd.f32 %v4695_v46, %v4539_v11  ;;  %v2952_v37 = vpop.f32.mrb[11].mxu0  ;;  %v3834_v34 = vpop.f32.mrb[21].mxu1 }
 0x4aa   : > { %v6534_v29 = vadd.f32 %v3822_v57, %v2952_v37 }
 0x4ac   : > { %v4542_v43 = vpop.f32.mrb[12].mxu0  ;;  %v4701_v25 = vpop.f32.mrb[22].mxu1 }
 0x4ad   : > { %v6536_v10 = vadd.f32 %v4698_v62, %v4542_v43  ;;  %v2966_v21 = vpop.f32.mrb[13].mxu0  ;;  %v3846_v24 = vpop.f32.mrb[23].mxu1 }
 0x4ae   : > { %v4771_v44 = vadd.f32 %v3834_v34, %v2966_v21 }
 0x4b0   : > { %v4545_v19 = vpop.f32.mrb[14].mxu0  ;;  %v4704_v4 = vpop.f32.mrb[24].mxu1 }
 0x4b1   : > { %v4772_v2 = vadd.f32 %v4701_v25, %v4545_v19  ;;  %v2980_v52 = vpop.f32.mrb[15].mxu0  ;;  %v3858_v27 = vpop.f32.mrb[25].mxu1 }
 0x4b2   : > { %v4773_v13 = vadd.f32 %v3846_v24, %v2980_v52 }
 0x4b4   : > { %v4548_v30 = vpop.f32.mrb[16].mxu0  ;;  %v4707_v33 = vpop.f32.mrb[26].mxu1 }
 0x4b5   : > { %v4774_v49 = vadd.f32 %v4704_v4, %v4548_v30  ;;  %v2994_v53 = vpop.f32.mrb[17].mxu0  ;;  %v3870_v55 = vpop.f32.mrb[27].mxu1 }
 0x4b6   : > { %v4775_v8 = vadd.f32 %v3858_v27, %v2994_v53 }
 0x4b8   : > { %v4551_v22 = vpop.f32.mrb[18].mxu0  ;;  %v4710_v51 = vpop.f32.mrb[28].mxu1 }
 0x4b9   : > { %v4776_v6 = vadd.f32 %v4707_v33, %v4551_v22  ;;  %v3008_v12 = vpop.f32.mrb[19].mxu0  ;;  %v3882_v63 = vpop.f32.mrb[29].mxu1 }
 0x4ba   : > { %v4777_v54 = vadd.f32 %v3870_v55, %v3008_v12 }
 0x4bc   : > { %v4554_v26 = vpop.f32.mrb[20].mxu0  ;;  %v4713_v0 = vpop.f32.mrb[30].mxu1 }
 0x4bd   : > { %v4778_v60 = vadd.f32 %v4710_v51, %v4554_v26  ;;  %v3022_v58 = vpop.f32.mrb[21].mxu0  ;;  %v3894_v5 = vpop.f32.mrb[31].mxu1 }
 0x4be   : > { %v4779_v23 = vadd.f32 %v3882_v63, %v3022_v58 }
 0x4c0   : > { %v4557_v14 = vpop.f32.mrb[22].mxu0  ;;  %v4716_v56 = vpop.f32.mrb[0].mxu1 }
 0x4c1   : > { %v4780_v61 = vadd.f32 %v4713_v0, %v4557_v14  ;;  %v4782_v40 = vadd.f32 %v4716_v56, %v6496_v59  ;;  %v3036_v35 = vpop.f32.mrb[23].mxu0  ;;  %v3906_v47 = vpop.f32.mrb[1].mxu1 }
 0x4c2   : > { %v4781_v3 = vadd.f32 %v3894_v5, %v3036_v35  ;;  %v4783_v46 = vadd.f32 %v3906_v47, %v6498_v41 }
 0x4c4   : > { %v4719_v28 = vpop.f32.mrb[2].mxu1 }
 0x4c5   : > { %v4784_v57 = vadd.f32 %v4719_v28, %v6500_v39  ;;  %v3918_v11 = vpop.f32.mrb[3].mxu1 }
 0x4c6   : > { %v4785_v62 = vadd.f32 %v3918_v11, %v6502_v50 }
 0x4c8   : > { %v4722_v37 = vpop.f32.mrb[4].mxu1 }
 0x4c9   : > { %v4786_v34 = vadd.f32 %v4722_v37, %v6504_v16  ;;  %v3930_v43 = vpop.f32.mrb[5].mxu1 }
 0x4ca   : > { %v4787_v25 = vadd.f32 %v3930_v43, %v6506_v15 }
 0x4cb   : > { %4026 = vrot.lane.b32.xlu1 %v4786_v34, %s5093_s22 }
 0x4cc   : > { %v4725_v59 = vpop.f32.mrb[6].mxu1  ;;  %4024 = vrot.lane.b32.xlu0 %v4787_v25, %s5093_s22 }
 0x4cd   : > { %v4788_v21 = vadd.f32 %v4725_v59, %v6508_v17  ;;  %v3942_v41 = vpop.f32.mrb[7].mxu1 }
 0x4ce   : > { %v4789_v24 = vadd.f32 %v3942_v41, %v6510_v42 }
 0x4cf   : > { %4030 = vrot.lane.b32.xlu1 %v4788_v21, %s5093_s22 }
 0x4d0   : > { %v4728_v39 = vpop.f32.mrb[8].mxu1  ;;  %4028 = vrot.lane.b32.xlu0 %v4789_v24, %s5093_s22 }
 0x4d1   : > { %v4790_v50 = vadd.f32 %v4728_v39, %v6512_v7  ;;  %v3954_v16 = vpop.f32.mrb[9].mxu1 }
 0x4d2   : > { %v4791_v15 = vadd.f32 %v3954_v16, %v6514_v1 }
 0x4d3   : > { %4034 = vrot.lane.b32.xlu1 %v4790_v50, %s5093_s22 }
 0x4d4   : > { %v4731_v19 = vpop.f32.mrb[10].mxu1  ;;  %4032 = vrot.lane.b32.xlu0 %v4791_v15, %s5093_s22 }
 0x4d5   : > { %v4792_v17 = vadd.f32 %v4731_v19, %v6516_v38  ;;  %v3966_v4 = vpop.f32.mrb[11].mxu1 }
 0x4d6   : > { %v4793_v42 = vadd.f32 %v3966_v4, %v6518_v18 }
 0x4d7   : > { %4038 = vrot.lane.b32.xlu1 %v4792_v17, %s5093_s22 }
 0x4d8   : > { %4036 = vrot.lane.b32.xlu0 %v4793_v42, %s5093_s22 }
 0x4db   : > { %3986 = vrot.lane.b32.xlu1 %v6536_v10, %s5093_s22 }
 0x4dc   : > { %3984 = vrot.lane.b32.xlu0 %v4771_v44, %s5093_s22 }
 0x4df   : > { %3990 = vrot.lane.b32.xlu1 %v4772_v2, %s5093_s22 }
 0x4e0   : > { %3988 = vrot.lane.b32.xlu0 %v4773_v13, %s5093_s22 }
 0x4e3   : > { %3994 = vrot.lane.b32.xlu1 %v4774_v49, %s5093_s22 }
 0x4e4   : > { %3992 = vrot.lane.b32.xlu0 %v4775_v8, %s5093_s22 }
 0x4e7   : > { %3998 = vrot.lane.b32.xlu1 %v4776_v6, %s5093_s22 }
 0x4e8   : > { %3996 = vrot.lane.b32.xlu0 %v4777_v54, %s5093_s22 }
 0x53d   : > { %v4027_v7 = vpop.permute.xlu1 %4026 }
 0x53e   : > { %v4049_v1 = vadd.f32 %v4778_v60, %v4027_v7  ;;  %v4025_v38 = vpop.permute.xlu0 %4024 }
 0x53f   : > { %v4048_v18 = vadd.f32 %v4779_v23, %v4025_v38 }
 0x540   : > { %4075 = vrot.lane.b32.xlu1 %v4049_v1, %s5097_s30 }
 0x541   : > { %v4031_v10 = vpop.permute.xlu1 %4030  ;;  %4073 = vrot.lane.b32.xlu0 %v4048_v18, %s5097_s30 }
 0x542   : > { %v4051_v44 = vadd.f32 %v4780_v61, %v4031_v10  ;;  %v4029_v2 = vpop.permute.xlu0 %4028 }
 0x543   : > { %v4050_v52 = vadd.f32 %v4781_v3, %v4029_v2 }
 0x544   : > { %4079 = vrot.lane.b32.xlu1 %v4051_v44, %s5097_s30 }
 0x545   : > { %v4035_v27 = vpop.permute.xlu1 %4034  ;;  %4077 = vrot.lane.b32.xlu0 %v4050_v52, %s5097_s30 }
 0x546   : > { %v4053_v13 = vadd.f32 %v4782_v40, %v4035_v27  ;;  %v4033_v30 = vpop.permute.xlu0 %4032 }
 0x547   : > { %v4052_v33 = vadd.f32 %v4783_v46, %v4033_v30 }
 0x548   : > { %4083 = vrot.lane.b32.xlu1 %v4053_v13, %s5097_s30 }
 0x549   : > { %v4039_v49 = vpop.permute.xlu1 %4038  ;;  %4081 = vrot.lane.b32.xlu0 %v4052_v33, %s5097_s30 }
 0x54a   : > { %v4055_v53 = vadd.f32 %v4784_v57, %v4039_v49  ;;  %v4037_v55 = vpop.permute.xlu0 %4036 }
 0x54b   : > { %v4054_v8 = vadd.f32 %v4785_v62, %v4037_v55 }
 0x54c   : > { %4087 = vrot.lane.b32.xlu1 %v4055_v53, %s5097_s30 }
 0x54d   : > { %v3987_v22 = vpop.permute.xlu1 %3986  ;;  %4085 = vrot.lane.b32.xlu0 %v4054_v8, %s5097_s30  ;;  %s5100_s30 = smov [#allocation3]  }
 0x54e   : > { %v4009_v51 = vadd.f32 %v6520_v20, %v3987_v22  ;;  %v3985_v6 = vpop.permute.xlu0 %3984  ;;  %s5014_s5 = sshll.u32 %s5100_s30, 4  ;;  %s5015_s5 = int_to_ptr.vmem [resolvable:$false] %s5014_s5 }
 0x54f   : > { %v4008_v12 = vadd.f32 %v6522_v31, %v3985_v6  ;;  %s5016_s6 = scalar_lea.vmem %s5015_s5, 2048  ;;  %p5017_p1 = scmp.lt.s32.totalorder %s6623_s21, %s5015_s5 }
 0x550   : > { %4058 = vst.msk [vmem:[%s6580_s13 + $0x8] sm:$0xff] %vm4056_vm3, %v4009_v51  ;;  %p5018_p2 = scmp.lt.s32.totalorder %s5016_s6, %s5010_s29 }
 0x551   : > { %4057 = vst.msk [vmem:[%s6580_s13] sm:$0xff] %vm4056_vm3, %v4008_v12  ;;  %v3991_v63 = vpop.permute.xlu1 %3990 }
 0x552   : > { %v4011_v54 = vadd.f32 %v6524_v45, %v3991_v63  ;;  %v3989_v20 = vpop.permute.xlu0 %3988  ;;  %p5019_p3 = por %p5018_p2, %p5017_p1 }
 0x553   : > { %v4010_v31 = vadd.f32 %v6526_v48, %v3989_v20 }
 0x554   : > { %4060 = vst.msk [vmem:[%s6580_s13 + $0x18] sm:$0xff] %vm4056_vm3, %v4011_v54  ;;  %p5020_p5 = pnand %p5019_p3, %p5013_p0 }
 0x555   : > { %4059 = vst.msk [vmem:[%s6580_s13 + $0x10] sm:$0xff] %vm4056_vm3, %v4010_v31  ;;  %v3995_v26 = vpop.permute.xlu1 %3994 }
 0x556   : > { %v4013_v0 = vadd.f32 %v6528_v36, %v3995_v26  ;;  %v3993_v60 = vpop.permute.xlu0 %3992 }
 0x557   : > { %v4012_v58 = vadd.f32 %v6530_v32, %v3993_v60 }
 0x558   : > { %4062 = vst.msk [vmem:[%s6580_s13 + $0x28] sm:$0xff] %vm4056_vm3, %v4013_v0 }
 0x559   : > { %4061 = vst.msk [vmem:[%s6580_s13 + $0x20] sm:$0xff] %vm4056_vm3, %v4012_v58  ;;  %v3999_v45 = vpop.permute.xlu1 %3998 }
 0x55a   : > { %v4015_v48 = vadd.f32 %v6532_v9, %v3999_v45  ;;  %v3997_v5 = vpop.permute.xlu0 %3996 }
 0x55b   : > { %v4014_v23 = vadd.f32 %v6534_v29, %v3997_v5 }
 0x55c   : > { %4064 = vst.msk [vmem:[%s6580_s13 + $0x38] sm:$0xff] %vm4056_vm3, %v4015_v48 }
 0x55d   : > { %4063 = vst.msk [vmem:[%s6580_s13 + $0x30] sm:$0xff] %vm4056_vm3, %v4014_v23 }
 0x5b2   : > { %v4076_v36 = vpop.permute.xlu1 %4075 }
 0x5b3   : > { %4099 = vst.msk [vmem:[%s6580_s13 + $0x8] sm:$0xff] %vm4097_vm4, %v4076_v36  ;;  %v4074_v32 = vpop.permute.xlu0 %4073 }
 0x5b4   : > { %4098 = vst.msk [vmem:[%s6580_s13] sm:$0xff] %vm4097_vm4, %v4074_v32 }
 0x5b6   : > { %v4080_v9 = vpop.permute.xlu1 %4079 }
 0x5b7   : > { %4101 = vst.msk [vmem:[%s6580_s13 + $0x18] sm:$0xff] %vm4097_vm4, %v4080_v9  ;;  %v4078_v14 = vpop.permute.xlu0 %4077 }
 0x5b8   : > { %4100 = vst.msk [vmem:[%s6580_s13 + $0x10] sm:$0xff] %vm4097_vm4, %v4078_v14 }
 0x5ba   : > { %v4084_v29 = vpop.permute.xlu1 %4083 }
 0x5bb   : > { %4103 = vst.msk [vmem:[%s6580_s13 + $0x28] sm:$0xff] %vm4097_vm4, %v4084_v29  ;;  %v4082_v56 = vpop.permute.xlu0 %4081 }
 0x5bc   : > { %4102 = vst.msk [vmem:[%s6580_s13 + $0x20] sm:$0xff] %vm4097_vm4, %v4082_v56 }
 0x5be   : > { %v4088_v61 = vpop.permute.xlu1 %4087 }
 0x5bf   : > { %4105 = vst.msk [vmem:[%s6580_s13 + $0x38] sm:$0xff] %vm4097_vm4, %v4088_v61  ;;  %v4086_v40 = vpop.permute.xlu0 %4085 }
 0x5c0   : > { %4104 = vst.msk [vmem:[%s6580_s13 + $0x30] sm:$0xff] %vm4097_vm4, %v4086_v40 }
 0x5c1   : > { %5023 = shalt.err (!%p5020_p5)
}
 0x5c2   : > { %s5024_s7 = scalar_lea.hbm %s6621_s26, 1024  ;;  %s5028_s10 = scalar_lea.hbm %s6681_s4, 2048 }
 0x5c3   : > { %p5025_p6 = scmp.ne.s32.totalorder %s6621_s26, %s5024_s7  ;;  %p5029_p10 = scmp.lt.u32.totalorder %s6621_s26, %s6681_s4 }
 0x5c4   : > { %p5030_p11 = scmp.lt.u32.totalorder %s5028_s10, %s5024_s7  ;;  %p5032_p13 = scmp.lt.u32.totalorder %s5024_s7, %s6621_s26 }
 0x5c5   : > { %p5026_p7 = pnand %p5025_p6, %p5168_p4 }
 0x5c6   : > { %p5031_p12 = por %p5030_p11, %p5029_p10 }
 0x5c7   : > { %p5027_p9 = pneg %p5026_p7 }
 0x5c8   : > { %p5033_p0 = por %p5032_p13, %p5031_p12 }
 0x5ca   : > { %p5034_p1 = pnand %p5033_p0, %p5027_p9 }
 0x5cc   : > { %5037 = shalt.err (!%p5034_p1)
}
 0x5cd   : > { %s5101_s13 = smov 128   ;;  %s5102_s14 = smov 8  }
 0x5ce   : > { %4942 = dma.vmem_to_hbm [thread:$0]  (%p5168_p4), %s6623_s21, 1024, %s6621_s26, %s6631_s18, %s5101_s13, %s5101_s13, %s5102_s14  }
 0x5cf PF: > { %p4948_p2 = scmp.ge.s32.totalorder %s5088_s20, 2  ;;  %s4137_s22 = sand.u32 1, %s5068_s15  }
 0x5d0   : > { %s4138_s24 = scalar_lea.sflag [#allocation4], %s4137_s22 }
 0x5d1   : > { %p4945_p3 = pnand %p4948_p2, %p5175_p8 }
 0x5d3   : > { %5063 = dma.done.wait (!%p4945_p3), %s4138_s24, 1024  }
 0x5d4   : > { %5065 = vsyncadd (!%p4945_p3), %s4138_s24, 4294966272  ;;  %s17_s20 = sadd.s32 1, %s5088_s20   ;;  %s6731_s15 = smov %s5072_s16 }
 0x5d5   : > { %p14_p5 = scmp.ge.s32.totalorder %s17_s20, 4   ;;  %s6732_s16 = smov %s5076_s17 }
 0x5d6   : > { %s6733_s17 = smov %s5181_s28  ;;  %s6734_s18 = smov %s5084_s19 }
 0x5d7   : > { %s6735_s19 = smov %s6737_s23  ;;  %16 = sbr.rel (!%p14_p5) target bundleno = 4 (0x4), region = 71 }
 0x5de   :  { %4143 = vsyncpa [#allocation4], 1 }
 0x5df   :  { %4145 = vsyncpa [#allocation4 + $0x1], 1 }

</bundles_post_ra>
